<compile_context>
chip_gen: v5e
topology: v5e:2x2
jax: 0.10.0
libtpu: 0.0.40
codegen_flags: <defaults>
</compile_context>

<pallas_src>
import functools

import jax
import jax.numpy as jnp
from jax.experimental import pallas as pl
from jax.experimental.pallas import tpu as pltpu

EMBEDDING_SIZE = 256
OUT_SIZE = 2 * EMBEDDING_SIZE  # Linear(embedding_size, embedding_size + embedding_size)


def _round_up(x, m):
    return (x + m - 1) // m * m


def _pick_tile(n_ctx_rows, n_rest_rows, c, e):
    """Row tile: multiple of 128, up to 1024, sized so padding waste stays small
    and the double-buffered (C, tile, E) bf16 context block stays ~<= 4 MiB."""
    tile = min(1024,
               _round_up(max(n_ctx_rows, 1), 128),
               _round_up(max(n_rest_rows, 1), 128))
    vmem_cap_rows = max(128, ((4 << 20) // max(1, c * e * 2 * 2)) // 128 * 128)
    return max(128, min(tile, vmem_cap_rows))


def _cbow_kernel(ctx_ref, rest_ref, w_ref, b_ref, o_ref, *, n_ctx_tiles, inv_c):
    # ctx_ref : (C, TILE, E) bf16  context-window embeddings (phase-0 input)
    # rest_ref: (TILE, E)    bf16  target/negative embeddings (phase-1 input)
    # w_ref   : (E, 2E)      bf16  resident transposed linear weight
    # b_ref   : (1, 2E)      f32   resident bias
    # o_ref   : (TILE, 2E)   bf16  one output row-tile per grid step
    i = pl.program_id(0)

    @pl.when(i < n_ctx_tiles)
    def _ctx_phase():
        # Mean-pool the context window in f32 on the VPU (no bf16 elementwise
        # math -> v5e-safe), then feed B pooled rows (not B*C) to the MXU.
        pooled = jnp.sum(ctx_ref[...].astype(jnp.float32), axis=0) * inv_c
        acc = jnp.dot(pooled.astype(jnp.bfloat16), w_ref[...],
                      preferred_element_type=jnp.float32)
        o_ref[...] = (acc + b_ref[...]).astype(o_ref.dtype)

    @pl.when(i >= n_ctx_tiles)
    def _rest_phase():
        acc = jnp.dot(rest_ref[...], w_ref[...],
                      preferred_element_type=jnp.float32)
        o_ref[...] = (acc + b_ref[...]).astype(o_ref.dtype)


def cbow_fused_pallas(ctx_rows, rest_rows, w_t_bf16, b_row, *,
                      tile, n_ctx_tiles, n_rest_tiles, inv_c):
    c, b_pad, e = ctx_rows.shape
    r_pad = rest_rows.shape[0]
    n_pad = b_pad + r_pad
    grid = (n_ctx_tiles + n_rest_tiles,)
    last_ctx = n_ctx_tiles - 1

    flops = 2 * n_pad * e * OUT_SIZE
    bytes_accessed = (
        c * b_pad * e * 2          # ctx rows (bf16)
        + r_pad * e * 2            # tgt/neg rows (bf16)
        + e * OUT_SIZE * 2         # weight (bf16, resident -- counted once)
        + OUT_SIZE * 4             # bias (f32)
        + n_pad * OUT_SIZE * 2     # output (bf16)
    )

    return pl.pallas_call(
        functools.partial(_cbow_kernel, n_ctx_tiles=n_ctx_tiles, inv_c=inv_c),
        out_shape=jax.ShapeDtypeStruct((n_pad, OUT_SIZE), jnp.bfloat16),
        grid_spec=pltpu.PrefetchScalarGridSpec(
            num_scalar_prefetch=0,
            grid=grid,
            in_specs=[
                # Context block: advances during phase 0, then parks on its
                # last block (unchanged index => no re-DMA) during phase 1.
                pl.BlockSpec((c, tile, e),
                             lambda i: (0, jnp.minimum(i, last_ctx), 0)),
                # Target/negative block: parked on block 0 during phase 0,
                # advances during phase 1.
                pl.BlockSpec((tile, e),
                             lambda i: (jnp.maximum(i - n_ctx_tiles, 0), 0)),
                pl.BlockSpec((e, OUT_SIZE), lambda i: (0, 0)),   # resident weight
                pl.BlockSpec((1, OUT_SIZE), lambda i: (0, 0)),   # resident bias
            ],
            out_specs=pl.BlockSpec((tile, OUT_SIZE), lambda i: (i, 0)),
        ),
        compiler_params=pltpu.CompilerParams(
            dimension_semantics=("parallel",),   # >=2 steps -> both v7x TCs busy
            vmem_limit_bytes=16 << 20,           # honest: actual use ~<= 8 MiB
        ),
        cost_estimate=pl.CostEstimate(
            flops=flops, transcendentals=0, bytes_accessed=bytes_accessed),
    )(ctx_rows, rest_rows, w_t_bf16, b_row)


@jax.jit
def word2vec_cbow_forward(params, context_words, target_words, negative_words):
    emb_bf16, w_t_bf16, b_row = params
    B, C = context_words.shape
    K = negative_words.shape[1]
    E = emb_bf16.shape[1]
    R = B + B * K                      # target rows + negative rows

    tile = _pick_tile(B, R, C, E)
    b_pad = _round_up(B, tile)
    r_pad = _round_up(R, tile)
    n_ctx_tiles = b_pad // tile
    n_rest_tiles = r_pad // tile

    # Pad / concatenate the TINY int32 id arrays (cheap) instead of the big
    # gathered activation rows; the gathers then directly produce the padded,
    # concatenated, kernel-ready layouts (no big pad/concat/cast HBM passes).
    ctx_ids = jnp.pad(context_words.T, ((0, 0), (0, b_pad - B)))         # (C, b_pad)
    rest_ids = jnp.pad(
        jnp.concatenate([target_words, negative_words.reshape(-1)]),
        (0, r_pad - R))                                                   # (r_pad,)

    # TODO(synk): for production vocab/batch sizes, move these row gathers
    # in-kernel (scalar-prefetch the id arrays, emb table in memory_space=
    # pl.ANY, manual DMA row gather into a VMEM staging buffer) to avoid the
    # gathered-rows HBM round trip; at E=256 the per-row DMAs are only 512 B,
    # so the fused XLA gather feeding bf16 rows is the faster option today.
    ctx_rows = jnp.take(emb_bf16, ctx_ids, axis=0)        # (C, b_pad, E) bf16
    rest_rows = jnp.take(emb_bf16, rest_ids, axis=0)      # (r_pad, E)    bf16

    out = cbow_fused_pallas(
        ctx_rows, rest_rows, w_t_bf16, b_row,
        tile=tile, n_ctx_tiles=n_ctx_tiles, n_rest_tiles=n_rest_tiles,
        inv_c=1.0 / C)                                     # (b_pad + r_pad, 2E) bf16

    context_out = out[:B].reshape(B, 1, OUT_SIZE)                         # (B, 1, 2E)
    target_out = out[b_pad:b_pad + B]                                     # (B, 2E)
    negative_out = out[b_pad + B:b_pad + B + B * K].reshape(B, K, OUT_SIZE)  # (B, K, 2E)

    # Matches the PyTorch return order: (context, negative, target).
    return context_out, negative_out, target_out


def reference_forward(params, context_words, target_words, negative_words):
    emb, w_t, b = params
    emb = emb.astype(jnp.float32)
    w_t = w_t.astype(jnp.float32)
    B, C = context_words.shape
    K = negative_words.shape[1]
    ctx = jnp.mean(jnp.take(emb, context_words, axis=0), axis=1) @ w_t + b
    ctx = ctx.reshape(B, 1, OUT_SIZE)
    tgt = jnp.take(emb, target_words, axis=0) @ w_t + b
    neg = jnp.take(emb, negative_words, axis=0) @ w_t + b[None]
    return ctx, neg, tgt


if __name__ == "__main__":
    key = jax.random.PRNGKey(0)
    k_emb, k_w, k_b, k_ctx, k_tgt, k_neg = jax.random.split(key, 6)

    vocab_size = 32
    B, C, K = 2, 4, 3  # batch, context window, negative samples

    # Deterministic parameter init (synthetic, matches nn.Embedding / nn.Linear shapes).
    emb_table = jax.random.normal(k_emb, (vocab_size, EMBEDDING_SIZE), jnp.float32)
    bound = 1.0 / jnp.sqrt(jnp.float32(EMBEDDING_SIZE))
    w = jax.random.uniform(k_w, (OUT_SIZE, EMBEDDING_SIZE), jnp.float32, -bound, bound)
    bias = jax.random.uniform(k_b, (OUT_SIZE,), jnp.float32, -bound, bound)

    # Pre-cast ONCE outside the jitted forward: bf16 table / weight halve the
    # gather + matmul-operand HBM traffic; bias stays f32 for the f32 bias add.
    params = (
        emb_table.astype(jnp.bfloat16),             # (vocab, E) bf16
        jnp.asarray(w.T).astype(jnp.bfloat16),      # (E, 2E)    bf16, kernel layout
        bias.reshape(1, OUT_SIZE),                  # (1, 2E)    f32
    )

    context_words = jax.random.randint(k_ctx, (B, C), 0, vocab_size, jnp.int32)
    target_words = jax.random.randint(k_tgt, (B,), 0, vocab_size, jnp.int32)
    negative_words = jax.random.randint(k_neg, (B, K), 0, vocab_size, jnp.int32)

    ctx_out, neg_out, tgt_out = word2vec_cbow_forward(
        params, context_words, target_words, negative_words)
    jax.block_until_ready((ctx_out, neg_out, tgt_out))

    assert ctx_out.shape == (B, 1, OUT_SIZE)
    assert neg_out.shape == (B, K, OUT_SIZE)
    assert tgt_out.shape == (B, OUT_SIZE)

    # Sanity check vs. an f32 reference using the same bf16 params
    # (bf16 operands + bf16 output store -> loose tolerance).
    ctx_ref, neg_ref, tgt_ref = reference_forward(
        params, context_words, target_words, negative_words)
    assert jnp.allclose(ctx_out.astype(jnp.float32), ctx_ref, atol=5e-2, rtol=5e-2)
    assert jnp.allclose(neg_out.astype(jnp.float32), neg_ref, atol=5e-2, rtol=5e-2)
    assert jnp.allclose(tgt_out.astype(jnp.float32), tgt_ref, atol=5e-2, rtol=5e-2)

    print("KERNEL_OK")
</pallas_src>

<mosaic_0001>
module attributes {stable_mosaic.version = 11 : i64} {
  func.func @_cbow_kernel(%arg0: i32, %arg1: memref<4x128x256xbf16, #tpu.memory_space<vmem>>, %arg2: memref<128x256xbf16, #tpu.memory_space<vmem>>, %arg3: memref<256x512xbf16, #tpu.memory_space<vmem>>, %arg4: memref<1x512xf32, #tpu.memory_space<vmem>>, %arg5: memref<128x512xbf16, #tpu.memory_space<vmem>>) attributes {dimension_semantics = [#tpu.dimension_semantics<parallel>], iteration_bounds = array<i64: 2>, scalar_prefetch = 0 : i64, scratch_operands = 0 : i64, tpu.core_type = #tpu.core_type<tc>, window_params = [{transform_indices = @transform_0, window_bounds = array<i64: 4, 128, 256>}, {transform_indices = @transform_1, window_bounds = array<i64: 128, 256>}, {pipeline_mode = #tpu.pipeline_mode<synchronous>, transform_indices = @transform_2, window_bounds = array<i64: 256, 512>}, {pipeline_mode = #tpu.pipeline_mode<synchronous>, transform_indices = @transform_3, window_bounds = array<i64: 1, 512>}, {transform_indices = @transform_4, window_bounds = array<i64: 128, 512>}]} {
    %c1_i32 = arith.constant 1 : i32
    %0 = arith.cmpi slt, %arg0, %c1_i32 : i32
    %1 = arith.extui %0 : i1 to i32
    %c0_i32 = arith.constant 0 : i32
    %2 = arith.cmpi ne, %1, %c0_i32 : i32
    scf.if %2 {
      %c0 = arith.constant 0 : index
      %c0_2 = arith.constant 0 : index
      %c0_3 = arith.constant 0 : index
      %6 = vector.load %arg1[%c0, %c0_2, %c0_3] : memref<4x128x256xbf16, #tpu.memory_space<vmem>>, vector<4x128x256xbf16>
      %7 = arith.extf %6 : vector<4x128x256xbf16> to vector<4x128x256xf32>
      %cst = arith.constant dense<0.000000e+00> : vector<128x256xf32>
      %8 = vector.multi_reduction <add>, %7, %cst [0] : vector<4x128x256xf32> to vector<128x256xf32>
      %cst_4 = arith.constant 2.500000e-01 : f32
      %9 = vector.broadcast %cst_4 : f32 to vector<128x256xf32>
      %10 = arith.mulf %8, %9 : vector<128x256xf32>
      %11 = arith.truncf %10 : vector<128x256xf32> to vector<128x256xbf16>
      %c0_5 = arith.constant 0 : index
      %c0_6 = arith.constant 0 : index
      %12 = vector.load %arg3[%c0_5, %c0_6] : memref<256x512xbf16, #tpu.memory_space<vmem>>, vector<256x512xbf16>
      %cst_7 = arith.constant dense<0.000000e+00> : vector<128x512xf32>
      %13 = tpu.matmul %11, %12, %cst_7 {dimension_numbers = #tpu.dot_dimension_numbers<[1], [0], [0], [1], [0, 0, 1, 1], [], []>} : vector<128x256xbf16>, vector<256x512xbf16>, vector<128x512xf32> -> vector<128x512xf32>
      %c0_8 = arith.constant 0 : index
      %c0_9 = arith.constant 0 : index
      %14 = vector.load %arg4[%c0_8, %c0_9] : memref<1x512xf32, #tpu.memory_space<vmem>>, vector<1x512xf32>
      %15 = vector.broadcast %14 : vector<1x512xf32> to vector<128x512xf32>
      %16 = arith.addf %13, %15 : vector<128x512xf32>
      %17 = arith.truncf %16 : vector<128x512xf32> to vector<128x512xbf16>
      %c0_10 = arith.constant 0 : index
      %c0_11 = arith.constant 0 : index
      %18 = vector.load %arg5[%c0_10, %c0_11] : memref<128x512xbf16, #tpu.memory_space<vmem>>, vector<128x512xbf16>
      tpu.vector_store %arg5[%c0_10, %c0_11], %17 {strides = array<i32>} : memref<128x512xbf16, #tpu.memory_space<vmem>>, vector<128x512xbf16>,
    } else {
    }
    %c1_i32_0 = arith.constant 1 : i32
    %3 = arith.cmpi sge, %arg0, %c1_i32_0 : i32
    %4 = arith.extui %3 : i1 to i32
    %c0_i32_1 = arith.constant 0 : i32
    %5 = arith.cmpi ne, %4, %c0_i32_1 : i32
    scf.if %5 {
      %c0 = arith.constant 0 : index
      %c0_2 = arith.constant 0 : index
      %6 = vector.load %arg2[%c0, %c0_2] : memref<128x256xbf16, #tpu.memory_space<vmem>>, vector<128x256xbf16>
      %c0_3 = arith.constant 0 : index
      %c0_4 = arith.constant 0 : index
      %7 = vector.load %arg3[%c0_3, %c0_4] : memref<256x512xbf16, #tpu.memory_space<vmem>>, vector<256x512xbf16>
      %cst = arith.constant dense<0.000000e+00> : vector<128x512xf32>
      %8 = tpu.matmul %6, %7, %cst {dimension_numbers = #tpu.dot_dimension_numbers<[1], [0], [0], [1], [0, 0, 1, 1], [], []>} : vector<128x256xbf16>, vector<256x512xbf16>, vector<128x512xf32> -> vector<128x512xf32>
      %c0_5 = arith.constant 0 : index
      %c0_6 = arith.constant 0 : index
      %9 = vector.load %arg4[%c0_5, %c0_6] : memref<1x512xf32, #tpu.memory_space<vmem>>, vector<1x512xf32>
      %10 = vector.broadcast %9 : vector<1x512xf32> to vector<128x512xf32>
      %11 = arith.addf %8, %10 : vector<128x512xf32>
      %12 = arith.truncf %11 : vector<128x512xf32> to vector<128x512xbf16>
      %c0_7 = arith.constant 0 : index
      %c0_8 = arith.constant 0 : index
      %13 = vector.load %arg5[%c0_7, %c0_8] : memref<128x512xbf16, #tpu.memory_space<vmem>>, vector<128x512xbf16>
      tpu.vector_store %arg5[%c0_7, %c0_8], %12 {strides = array<i32>} : memref<128x512xbf16, #tpu.memory_space<vmem>>, vector<128x512xbf16>,
    } else {
    }
    return
  }
  func.func @transform_0(%arg0: i32) -> (i32, i32, i32) {
    %c0_i32 = arith.constant 0 : i32
    %0 = arith.minsi %arg0, %c0_i32 : i32
    %c0_i32_0 = arith.constant 0 : i32
    %c0_i32_1 = arith.constant 0 : i32
    %c0_i32_2 = arith.constant 0 : i32
    return %c0_i32_0, %0, %c0_i32_1 : i32, i32, i32
  }
  func.func @transform_1(%arg0: i32) -> (i32, i32) {
    %c1_i32 = arith.constant 1 : i32
    %0 = arith.subi %arg0, %c1_i32 : i32
    %c0_i32 = arith.constant 0 : i32
    %1 = arith.maxsi %0, %c0_i32 : i32
    %c0_i32_0 = arith.constant 0 : i32
    %c0_i32_1 = arith.constant 0 : i32
    return %1, %c0_i32_0 : i32, i32
  }
  func.func @transform_2(%arg0: i32) -> (i32, i32) {
    %c0_i32 = arith.constant 0 : i32
    %c0_i32_0 = arith.constant 0 : i32
    %c0_i32_1 = arith.constant 0 : i32
    return %c0_i32, %c0_i32_0 : i32, i32
  }
  func.func @transform_3(%arg0: i32) -> (i32, i32) {
    %c0_i32 = arith.constant 0 : i32
    %c0_i32_0 = arith.constant 0 : i32
    %c0_i32_1 = arith.constant 0 : i32
    return %c0_i32, %c0_i32_0 : i32, i32
  }
  func.func @transform_4(%arg0: i32) -> (i32, i32) {
    %c0_i32 = arith.constant 0 : i32
    %c0_i32_0 = arith.constant 0 : i32
    return %arg0, %c0_i32 : i32, i32
  }
}

</mosaic_0001>

<bundles_post_ra>
// kernel: word2vec_cbow_forward.1
= control target key start
LH: loop header
LB: loop body
LE: loop exit
PB: predicated region body
PF: predicated region fallthrough
CT: control target
= control target key end

     0   :  { %s3261_s15 = smov 0   ;;  %s4669_s0 = inlined_call_operand.vmem [shape: bf16[4,128,256], index: 0, kind: input, shape index: {}]   ;;  %s4670_s1 = inlined_call_operand.vmem [shape: bf16[128,256], index: 1, kind: input, shape index: {}]   ;;  %s4671_s2 = inlined_call_operand.vmem [shape: bf16[256,512], index: 2, kind: input, shape index: {}]   ;;  %s4672_s3 = inlined_call_operand.vmem [shape: f32[1,512], index: 3, kind: input, shape index: {}]   ;;  %s4673_s4 = inlined_call_operand.vmem [shape: bf16[256,512], index: 4, kind: output, shape index: {}]  }
   0x1 LB: > { %s3267_s16 = sadd.s32 4294967295, %s3234_s15   ;;  %p2482_p0 = scmp.ge.s32.totalorder %s3234_s15, 1  ;;  %s3234_s15 = sphi %s3261_s15, %s14_s15  }
   0x2   : > { %p196_p1 = scmp.lt.s32.totalorder %s3234_s15, 3 }
   0x4   : > { %p197_p2 = pnand %p2482_p0, %p196_p1 }
   0x5   : > { %p235_p3 = scmp.lt.s32.totalorder (!%p197_p2), %s3267_s16, 0  ;;  %s2486_s17 = sadd.s32 (!%p197_p2), 4294967295, %s3267_s16 }
   0x6   : > { %200 = sbr.rel (%p197_p2) target bundleno = 872 (0x368), region = 36  ;;  %p247_p4 = scmp.gt.s32.totalorder (!%p197_p2), %s2486_s17, 0 }
   0x7   : > { %s2490_s18 = sshll.u32 (!%p197_p2), %s3267_s16, 4  ;;  %p2493_p8 = scmp.ge.s32.totalorder (!%p197_p2), %s3267_s16, 1 }
   0x8   : > { %p260_p7 = scmp.lt.s32.totalorder (!%p197_p2), %s2490_s18, 31 }
   0xb   : > { %s236_s19 = scalar_select %p235_p3, %s3267_s16, 0 }
   0xc   : > { %s4675_s17 = smov (!%p247_p4, %s2486_s17), 0  ;;  %s4681_s18 = smov (!%p260_p7, %s2490_s18), 31 }
   0xd   : > { %s2483_s20 = sshll.u32 %s236_s19, 4  ;;  %s2487_s21 = sshll.u32 %s4675_s17, 4 }
   0xe   : > { %p238_p5 = scmp.lt.s32.totalorder %s2483_s20, 15  ;;  %p250_p6 = scmp.lt.s32.totalorder %s2487_s21, 15 }
   0xf   : > { %s3075_s30 = sshll.u32 %s4681_s18, 4  ;;  %269 = sbr.rel (%p2493_p8) target bundleno = 443 (0x1bb), region = 40 }
  0x10   : > { %s4677_s20 = smov (!%p238_p5, %s2483_s20), 15  ;;  %s4679_s21 = smov (!%p250_p6, %s2487_s21), 15 }
  0x11   : > { %s3073_s22 = sshll.u32 %s4677_s20, 3  ;;  %s3074_s26 = sshll.u32 %s4679_s21, 3 }
  0x12   : > { %s3278_s25 = scalar_lea.vmem %s4669_s0, %s3073_s22  ;;  %s3283_s29 = scalar_lea.vmem %s4670_s1, %s3074_s26 }
  0x13   : > { %s3288_s7 = scalar_lea.vmem %s4673_s4, %s3075_s30 }
  0x14   : > { %v2608_v0 = vld [vmem:[%s4671_s2 + $0xe0] sm:$0xf]  ;;  %v3106_v1 = vld [vmem:[%s4671_s2 + $0xec] sm:$0xf0]  ;;  %v3104_v5 = vld [vmem:[%s4671_s2 + $0xe4] sm:$0xf] }
  0x15   : > { %v2736_v2 = vld [vmem:[%s4671_s2 + $0x1e0] sm:$0xf]  ;;  %v2609_v3 = vor.u32 %v3106_v1, %v2608_v0  ;;  %v3138_v4 = vld [vmem:[%s4671_s2 + $0x1ec] sm:$0xf0]  ;;  %v2610_v6 = vld [vmem:[%s4671_s2 + $0xf0] sm:$0xf0] }
  0x16   : > { %v2737_v7 = vor.u32 %v3138_v4, %v2736_v2  ;;  %v2613_v8 = vor.u32 %v3104_v5, %v2610_v6  ;;  %v3136_v9 = vld [vmem:[%s4671_s2 + $0x1e4] sm:$0xf]  ;;  %v2738_v10 = vld [vmem:[%s4671_s2 + $0x1f0] sm:$0xf0]  ;;  %v2592_v11 = vld [vmem:[%s4671_s2 + $0xc0] sm:$0xf] }
  0x17   : > { %1000 = vmatpush.bf16.msra.mxu0 %v2609_v3  ;;  %v2741_v12 = vor.u32 %v3136_v9, %v2738_v10  ;;  %v3102_v13 = vld [vmem:[%s4671_s2 + $0xcc] sm:$0xf0]  ;;  %v2720_v14 = vld [vmem:[%s4671_s2 + $0x1c0] sm:$0xf]  ;;  %v3100_v18 = vld [vmem:[%s4671_s2 + $0xc4] sm:$0xf] }
  0x18   : > { %v3134_v15 = vld [vmem:[%s4671_s2 + $0x1cc] sm:$0xf0]  ;;  %1049 = vmatpush.bf16.msra.mxu1 %v2737_v7  ;;  %1098 = vmatpush.bf16.msra.mxu2 %v2613_v8  ;;  %v2593_v16 = vor.u32 %v3102_v13, %v2592_v11  ;;  %v2594_v19 = vld [vmem:[%s4671_s2 + $0xd0] sm:$0xf0]  ;;  %v3132_v20 = vld [vmem:[%s4671_s2 + $0x1c4] sm:$0xf] }
  0x19   : > { %v2721_v17 = vor.u32 %v3134_v15, %v2720_v14  ;;  %1147 = vmatpush.bf16.msra.mxu3 %v2741_v12  ;;  %v2597_v21 = vor.u32 %v3100_v18, %v2594_v19  ;;  %v2722_v22 = vld [vmem:[%s4671_s2 + $0x1d0] sm:$0xf0]  ;;  %v2576_v23 = vld [vmem:[%s4671_s2 + $0xa0] sm:$0xf]  ;;  %v3098_v24 = vld [vmem:[%s4671_s2 + $0xac] sm:$0xf0] }
  0x1a   : > { %v2725_v25 = vor.u32 %v3132_v20, %v2722_v22  ;;  %v2704_v26 = vld [vmem:[%s4671_s2 + $0x1a0] sm:$0xf]  ;;  %v3130_v27 = vld [vmem:[%s4671_s2 + $0x1ac] sm:$0xf0]  ;;  %v3096_v28 = vld [vmem:[%s4671_s2 + $0xa4] sm:$0xf]  ;;  %v2577_v29 = vor.u32 %v3098_v24, %v2576_v23 }
  0x1b   : > { %1001 = vmatpush.bf16.msra.mxu0 %v2593_v16  ;;  %v2578_v30 = vld [vmem:[%s4671_s2 + $0xb0] sm:$0xf0]  ;;  %v3128_v31 = vld [vmem:[%s4671_s2 + $0x1a4] sm:$0xf]  ;;  %v2705_v33 = vor.u32 %v3130_v27, %v2704_v26  ;;  %v2560_v35 = vld [vmem:[%s4671_s2 + $0x80] sm:$0xf] }
  0x1c   : > { %v2706_v32 = vld [vmem:[%s4671_s2 + $0x1b0] sm:$0xf0]  ;;  %1050 = vmatpush.bf16.msra.mxu1 %v2721_v17  ;;  %1099 = vmatpush.bf16.msra.mxu2 %v2597_v21  ;;  %v2581_v34 = vor.u32 %v3096_v28, %v2578_v30  ;;  %v3094_v36 = vld [vmem:[%s4671_s2 + $0x8c] sm:$0xf0]  ;;  %v2688_v37 = vld [vmem:[%s4671_s2 + $0x180] sm:$0xf] }
  0x1d   : > { %1148 = vmatpush.bf16.msra.mxu3 %v2725_v25  ;;  %v2709_v38 = vor.u32 %v3128_v31, %v2706_v32  ;;  %v3126_v39 = vld [vmem:[%s4671_s2 + $0x18c] sm:$0xf0]  ;;  %v3092_v40 = vld [vmem:[%s4671_s2 + $0x84] sm:$0xf]  ;;  %v2562_v41 = vld [vmem:[%s4671_s2 + $0x90] sm:$0xf0]  ;;  %v2561_v44 = vor.u32 %v3094_v36, %v2560_v35 }
  0x1e   : > { %v3124_v42 = vld [vmem:[%s4671_s2 + $0x184] sm:$0xf]  ;;  %v2690_v43 = vld [vmem:[%s4671_s2 + $0x190] sm:$0xf0]  ;;  %v2544_v45 = vld [vmem:[%s4671_s2 + $0x60] sm:$0xf]  ;;  %v2689_v47 = vor.u32 %v3126_v39, %v2688_v37  ;;  %v2565_v48 = vor.u32 %v3092_v40, %v2562_v41 }
  0x1f   : > { %1002 = vmatpush.bf16.msra.mxu0 %v2577_v29  ;;  %v3090_v46 = vld [vmem:[%s4671_s2 + $0x6c] sm:$0xf0]  ;;  %v2672_v49 = vld [vmem:[%s4671_s2 + $0x160] sm:$0xf]  ;;  %v3088_v51 = vld [vmem:[%s4671_s2 + $0x64] sm:$0xf]  ;;  %v2693_v52 = vor.u32 %v3124_v42, %v2690_v43 }
  0x20   : > { %1051 = vmatpush.bf16.msra.mxu1 %v2705_v33  ;;  %1100 = vmatpush.bf16.msra.mxu2 %v2581_v34  ;;  %v3122_v50 = vld [vmem:[%s4671_s2 + $0x16c] sm:$0xf0]  ;;  %v2546_v53 = vld [vmem:[%s4671_s2 + $0x70] sm:$0xf0]  ;;  %v3120_v54 = vld [vmem:[%s4671_s2 + $0x164] sm:$0xf]  ;;  %v2545_v61 = vor.u32 %v3090_v46, %v2544_v45 }
  0x21   : > { %1149 = vmatpush.bf16.msra.mxu3 %v2709_v38  ;;  %v2674_v55 = vld [vmem:[%s4671_s2 + $0x170] sm:$0xf0]  ;;  %v2528_v56 = vld [vmem:[%s4671_s2 + $0x40] sm:$0xf]  ;;  %v3086_v57 = vld [vmem:[%s4671_s2 + $0x4c] sm:$0xf0]  ;;  %v2673_v1 = vor.u32 %v3122_v50, %v2672_v49  ;;  %v2549_v2 = vor.u32 %v3088_v51, %v2546_v53 }
  0x22   : > { %v2656_v58 = vld [vmem:[%s4671_s2 + $0x140] sm:$0xf]  ;;  %v3118_v59 = vld [vmem:[%s4671_s2 + $0x14c] sm:$0xf0]  ;;  %v3084_v60 = vld [vmem:[%s4671_s2 + $0x44] sm:$0xf]  ;;  %v2677_v6 = vor.u32 %v3120_v54, %v2674_v55  ;;  %v2529_v13 = vor.u32 %v3086_v57, %v2528_v56 }
  0x23   : > { %1003 = vmatpush.bf16.msra.mxu0 %v2561_v44  ;;  %v2530_v62 = vld [vmem:[%s4671_s2 + $0x50] sm:$0xf0]  ;;  %v3432_v63 = vld [vmem:[%s4671_s2 + $0x144] sm:$0xf]  ;;  %v3442_v3 = vld [vmem:[%s4671_s2 + $0x20] sm:$0xf]  ;;  %v2657_v14 = vor.u32 %v3118_v59, %v2656_v58 }
  0x24   : > { %v3437_v0 = vld [vmem:[%s4671_s2 + $0x150] sm:$0xf0]  ;;  %1052 = vmatpush.bf16.msra.mxu1 %v2689_v47  ;;  %1101 = vmatpush.bf16.msra.mxu2 %v2565_v48  ;;  %v3447_v4 = vld [vmem:[%s4671_s2 + $0x2c] sm:$0xf0]  ;;  %v3452_v5 = vld [vmem:[%s4671_s2 + $0x120] sm:$0xf]  ;;  %v2533_v15 = vor.u32 %v3084_v60, %v2530_v62 }
  0x25   : > { %1150 = vmatpush.bf16.msra.mxu3 %v2693_v52  ;;  %v3457_v7 = vld [vmem:[%s4671_s2 + $0x12c] sm:$0xf0]  ;;  %v3462_v8 = vld [vmem:[%s4671_s2 + $0x24] sm:$0xf]  ;;  %v3467_v9 = vld [vmem:[%s4671_s2 + $0x30] sm:$0xf0]  ;;  %v2661_v16 = vor.u32 %v3432_v63, %v3437_v0  ;;  %v2513_v20 = vor.u32 %v3447_v4, %v3442_v3 }
  0x26   : > { %v3472_v10 = vld [vmem:[%s4671_s2 + $0x124] sm:$0xf]  ;;  %v3477_v11 = vld [vmem:[%s4671_s2 + $0x130] sm:$0xf0]  ;;  %v3482_v12 = vld [vmem:[%s4671_s2] sm:$0xf]  ;;  %v2641_v21 = vor.u32 %v3457_v7, %v3452_v5  ;;  %v2517_v22 = vor.u32 %v3462_v8, %v3467_v9 }
  0x27   : > { %1004 = vmatpush.bf16.msra.mxu0 %v2545_v61  ;;  %v3489_v17 = vld [vmem:[%s4671_s2 + $0xc] sm:$0xf0]  ;;  %v3494_v18 = vld [vmem:[%s4671_s2 + $0x100] sm:$0xf]  ;;  %v3510_v23 = vld [vmem:[%s4671_s2 + $0x4] sm:$0xf]  ;;  %v2645_v26 = vor.u32 %v3472_v10, %v3477_v11 }
  0x28   : > { %v3499_v19 = vld [vmem:[%s4671_s2 + $0x10c] sm:$0xf0]  ;;  %1053 = vmatpush.bf16.msra.mxu1 %v2673_v1  ;;  %1102 = vmatpush.bf16.msra.mxu2 %v2549_v2  ;;  %v3515_v24 = vld [vmem:[%s4671_s2 + $0x10] sm:$0xf0]  ;;  %v3520_v25 = vld [vmem:[%s4671_s2 + $0x104] sm:$0xf]  ;;  %v2497_v27 = vor.u32 %v3489_v17, %v3482_v12 }
  0x29   : > { %1151 = vmatpush.bf16.msra.mxu3 %v2677_v6  ;;  %v2625_v28 = vor.u32 %v3499_v19, %v3494_v18  ;;  %v2501_v29 = vor.u32 %v3510_v23, %v3515_v24  ;;  %v3533_v30 = vld [vmem:[%s4671_s2 + $0x110] sm:$0xf0]  ;;  %v270_v31 = vld [vmem:[%s3278_s25] sm:$0xff]  ;;  %v271_v32 = vld [vmem:[%s3278_s25 + $0x8] sm:$0xff] }
  0x2a   : > { %v2629_v33 = vor.u32 %v3520_v25, %v3533_v30  ;;  %v286_v34 = vld [vmem:[%s3278_s25 + $0x80] sm:$0xff]  ;;  %v287_v35 = vld [vmem:[%s3278_s25 + $0x88] sm:$0xff]  ;;  %v334_v37 = vunpack.c.l.bf16 %v270_v31  ;;  %v336_v38 = vunpack.c.l.bf16 %v271_v32  ;;  %v335_v39 = vunpack.c.h.bf16 %v270_v31  ;;  %v2618_v52 = vld [vmem:[%s4671_s2 + $0xf8] sm:$0xf0] }
  0x2b   : > { %v302_v36 = vld [vmem:[%s3278_s25 + $0x100] sm:$0xff]  ;;  %1005 = vmatpush.bf16.msra.mxu0 %v2529_v13  ;;  %v303_v40 = vld [vmem:[%s3278_s25 + $0x108] sm:$0xff]  ;;  %v366_v43 = vunpack.c.l.bf16 %v286_v34  ;;  %v368_v44 = vunpack.c.l.bf16 %v287_v35  ;;  %v337_v46 = vunpack.c.h.bf16 %v271_v32  ;;  %v367_v50 = vunpack.c.h.bf16 %v286_v34  ;;  %v2746_v58 = vld [vmem:[%s4671_s2 + $0x1f8] sm:$0xf0] }
  0x2c   : > { %v318_v41 = vld [vmem:[%s3278_s25 + $0x180] sm:$0xff]  ;;  %v319_v42 = vld [vmem:[%s3278_s25 + $0x188] sm:$0xff]  ;;  %v398_v45 = vunpack.c.l.bf16 %v302_v36  ;;  %1054 = vmatpush.bf16.msra.mxu1 %v2657_v14  ;;  %1103 = vmatpush.bf16.msra.mxu2 %v2533_v15  ;;  %v400_v47 = vunpack.c.l.bf16 %v303_v40  ;;  %v369_v56 = vunpack.c.h.bf16 %v287_v35  ;;  %v399_v57 = vunpack.c.h.bf16 %v302_v36  ;;  %v3107_v60 = vld [vmem:[%s4671_s2 + $0xf4] sm:$0xf0] }
  0x2d   : > { %v430_v48 = vunpack.c.l.bf16 %v318_v41  ;;  %v432_v49 = vunpack.c.l.bf16 %v319_v42  ;;  %v3105_v51 = vld [vmem:[%s4671_s2 + $0xec] sm:$0xf]  ;;  %1152 = vmatpush.bf16.msra.mxu3 %v2661_v16  ;;  %v462_v54 = vadd.f32 %v366_v43, %v334_v37  ;;  %v468_v55 = vadd.f32 %v368_v44, %v336_v38  ;;  %v2616_v59 = vld [vmem:[%s4671_s2 + $0xe8] sm:$0xf]  ;;  %v3571_v2 = vld [vmem:[%s4671_s2 + $0x1f4] sm:$0xf0] }
  0x2e   : > { %v3137_v53 = vld [vmem:[%s4671_s2 + $0x1ec] sm:$0xf]  ;;  %v401_v61 = vunpack.c.h.bf16 %v303_v40  ;;  %v431_v62 = vunpack.c.h.bf16 %v318_v41  ;;  %v433_v63 = vunpack.c.h.bf16 %v319_v42  ;;  %v465_v0 = vadd.f32 %v367_v50, %v335_v39  ;;  %v3566_v1 = vld [vmem:[%s4671_s2 + $0x1e8] sm:$0xf]  ;;  %v3574_v3 = vld [vmem:[%s3278_s25 + $0x10] sm:$0xff] }
  0x2f   : > { %1006 = vmatpush.bf16.msra.mxu0 %v2513_v20  ;;  %v463_v4 = vadd.f32 %v462_v54, %v398_v45  ;;  %v469_v5 = vadd.f32 %v468_v55, %v400_v47  ;;  %v471_v6 = vadd.f32 %v369_v56, %v337_v46  ;;  %v2621_v7 = vor.u32 %v3105_v51, %v2618_v52  ;;  %v3577_v8 = vld [vmem:[%s3278_s25 + $0x18] sm:$0xff]  ;;  %v288_v9 = vld [vmem:[%s3278_s25 + $0x90] sm:$0xff]  ;;  %v3101_v25 = vld [vmem:[%s4671_s2 + $0xcc] sm:$0xf] }
  0x30   : > { %v3581_v10 = vld [vmem:[%s3278_s25 + $0x98] sm:$0xff]  ;;  %1055 = vmatpush.bf16.msra.mxu1 %v2641_v21  ;;  %1104 = vmatpush.bf16.msra.mxu2 %v2517_v22  ;;  %v466_v11 = vadd.f32 %v465_v0, %v399_v57  ;;  %v2749_v13 = vor.u32 %v3137_v53, %v2746_v58  ;;  %v2617_v14 = vor.u32 %v3107_v60, %v2616_v59  ;;  %v304_v15 = vld [vmem:[%s3278_s25 + $0x110] sm:$0xff]  ;;  %v338_v16 = vunpack.c.l.bf16 %v3574_v3  ;;  %v3133_v30 = vld [vmem:[%s4671_s2 + $0x1cc] sm:$0xf] }
  0x31   : > { %1153 = vmatpush.bf16.msra.mxu3 %v2645_v26  ;;  %v464_v20 = vadd.f32 %v463_v4, %v430_v48  ;;  %v470_v31 = vadd.f32 %v469_v5, %v432_v49  ;;  %v472_v32 = vadd.f32 %v471_v6, %v401_v61  ;;  %v2745_v34 = vor.u32 %v3571_v2, %v3566_v1  ;;  %v305_v35 = vld [vmem:[%s3278_s25 + $0x118] sm:$0xff]  ;;  %v3589_v36 = vld [vmem:[%s3278_s25 + $0x190] sm:$0xff]  ;;  %v2600_v51 = vld [vmem:[%s4671_s2 + $0xc8] sm:$0xf] }
  0x32   : > { %v3592_v37 = vld [vmem:[%s3278_s25 + $0x198] sm:$0xff]  ;;  %v467_v21 = vadd.f32 %v466_v11, %v431_v62  ;;  %v340_v22 = vunpack.c.l.bf16 %v3577_v8  ;;  %v370_v38 = vunpack.c.l.bf16 %v288_v9  ;;  %v372_v39 = vunpack.c.l.bf16 %v3581_v10  ;;  %v2728_v56 = vld [vmem:[%s4671_s2 + $0x1c8] sm:$0xf]  ;;  %v274_v2 = vld [vmem:[%s3278_s25 + $0x20] sm:$0xff] }
  0x33   : > { %1007 = vmatpush.bf16.msra.mxu0 %v2497_v27  ;;  %v558_v26 = vmul.f32 0.25, %v464_v20  ;;  %v560_v40 = vmul.f32 0.25, %v470_v31  ;;  %v473_v41 = vadd.f32 %v472_v32, %v433_v63  ;;  %v402_v42 = vunpack.c.l.bf16 %v304_v15  ;;  %v2730_v50 = vld [vmem:[%s4671_s2 + $0x1d8] sm:$0xf0]  ;;  %v3103_v52 = vld [vmem:[%s4671_s2 + $0xd4] sm:$0xf0] }
  0x34   : > { %1056 = vmatpush.bf16.msra.mxu1 %v2625_v28  ;;  %1105 = vmatpush.bf16.msra.mxu2 %v2501_v29  ;;  %v559_v43 = vmul.f32 0.25, %v467_v21  ;;  %v404_v44 = vunpack.c.l.bf16 %v305_v35  ;;  %v434_v45 = vunpack.c.l.bf16 %v3589_v36  ;;  %v436_v46 = vunpack.c.l.bf16 %v3592_v37  ;;  %v2602_v29 = vld [vmem:[%s4671_s2 + $0xd8] sm:$0xf0]  ;;  %v3135_v57 = vld [vmem:[%s4671_s2 + $0x1d4] sm:$0xf0]  ;;  %v275_v5 = vld [vmem:[%s3278_s25 + $0x28] sm:$0xff] }
  0x35   : > { %1154 = vmatpush.bf16.msra.mxu3 %v2629_v33  ;;  %v3610_v12 = vpack.c.bf16 %v560_v40, %v558_v26  ;;  %v561_v17 = vmul.f32 0.25, %v473_v41  ;;  %v474_v18 = vadd.f32 %v370_v38, %v338_v16  ;;  %v480_v19 = vadd.f32 %v372_v39, %v340_v22  ;;  %v290_v6 = vld [vmem:[%s3278_s25 + $0xa0] sm:$0xff]  ;;  %v3097_v32 = vld [vmem:[%s4671_s2 + $0xac] sm:$0xf]  ;;  %v2714_v38 = vld [vmem:[%s4671_s2 + $0x1b8] sm:$0xf0] }
  0x36   : > { %v339_v23 = vunpack.c.h.bf16 %v3574_v3  ;;  %v341_v24 = vunpack.c.h.bf16 %v3577_v8  ;;  %v371_v27 = vunpack.c.h.bf16 %v288_v9  ;;  %v373_v28 = vunpack.c.h.bf16 %v3581_v10  ;;  %v2584_v39 = vld [vmem:[%s4671_s2 + $0xa8] sm:$0xf]  ;;  %v3099_v26 = vld [vmem:[%s4671_s2 + $0xb4] sm:$0xf0] }
  0x37   : > { %1196 = vmatpush.bf16.msrb.mxu0 %v2617_v14  ;;  %v3625_v33 = vpack.c.bf16 %v561_v17, %v559_v43  ;;  %1106 = vmatmul.bf16.vlgmr.msra.gmra.mxu2 %v3610_v12  ;;  %v475_v47 = vadd.f32 %v474_v18, %v402_v42  ;;  %v481_v48 = vadd.f32 %v480_v19, %v404_v44  ;;  %v403_v49 = vunpack.c.h.bf16 %v304_v15  ;;  %v307_v14 = vld [vmem:[%s3278_s25 + $0x128] sm:$0xff]  ;;  %v3131_v44 = vld [vmem:[%s4671_s2 + $0x1b4] sm:$0xf0]  ;;  %v322_v19 = vld [vmem:[%s3278_s25 + $0x1a0] sm:$0xff] }
  0x38   : > { %1294 = vmatpush.bf16.msrb.mxu2 %v2621_v7  ;;  %1008 = vmatmul.bf16.vlgmr.msra.gmra.mxu0 %v3610_v12  ;;  %v405_v53 = vunpack.c.h.bf16 %v305_v35  ;;  %v435_v54 = vunpack.c.h.bf16 %v3589_v36  ;;  %v477_v55 = vadd.f32 %v371_v27, %v339_v23  ;;  %v437_v60 = vunpack.c.h.bf16 %v3592_v37  ;;  %v291_v7 = vld [vmem:[%s3278_s25 + $0xa8] sm:$0xff] }
  0x39   : > { %1343 = vmatpush.bf16.msrb.mxu3 %v2749_v13  ;;  %1245 = vmatpush.bf16.msrb.mxu1 %v2745_v34  ;;  %v476_v58 = vadd.f32 %v475_v47, %v434_v45  ;;  %v482_v59 = vadd.f32 %v481_v48, %v436_v46  ;;  %v483_v61 = vadd.f32 %v373_v28, %v341_v24  ;;  %v306_v13 = vld [vmem:[%s3278_s25 + $0x120] sm:$0xff]  ;;  %v342_v15 = vunpack.c.l.bf16 %v274_v2  ;;  %v2586_v34 = vld [vmem:[%s4671_s2 + $0xb8] sm:$0xf0]  ;;  %v3129_v35 = vld [vmem:[%s4671_s2 + $0x1ac] sm:$0xf] }
  0x3a   : > { %1057 = vmatmul.bf16.vlgmr.msra.gmra.mxu1 %v3625_v33  ;;  %1155 = vmatmul.bf16.vlgmr.msra.gmra.mxu3 %v3625_v33  ;;  %v478_v62 = vadd.f32 %v477_v55, %v403_v49  ;;  %v2605_v63 = vor.u32 %v3101_v25, %v2602_v29  ;;  %v2733_v0 = vor.u32 %v3133_v30, %v2730_v50  ;;  %v344_v16 = vunpack.c.l.bf16 %v275_v5  ;;  %v2712_v43 = vld [vmem:[%s4671_s2 + $0x1a8] sm:$0xf] }
  0x3b   : > { %v2601_v1 = vor.u32 %v3103_v52, %v2600_v51  ;;  %v484_v3 = vadd.f32 %v483_v61, %v405_v53  ;;  %v2729_v4 = vor.u32 %v3135_v57, %v2728_v56  ;;  %v562_v8 = vmul.f32 0.25, %v476_v58  ;;  %v323_v23 = vld [vmem:[%s3278_s25 + $0x1a8] sm:$0xff] }
  0x3c   : > { %1295 = vmatpush.bf16.msrb.mxu2 %v2605_v63  ;;  %v564_v9 = vmul.f32 0.25, %v482_v59  ;;  %v479_v10 = vadd.f32 %v478_v62, %v435_v54  ;;  %v374_v20 = vunpack.c.l.bf16 %v290_v6  ;;  %v376_v31 = vunpack.c.l.bf16 %v291_v7  ;;  %v3093_v58 = vld [vmem:[%s4671_s2 + $0x8c] sm:$0xf]  ;;  %v2570_v59 = vld [vmem:[%s4671_s2 + $0x98] sm:$0xf0] }
  0x3d   : > { %1344 = vmatpush.bf16.msrb.mxu3 %v2733_v0  ;;  %v485_v11 = vadd.f32 %v484_v3, %v437_v60  ;;  %1197 = vmatpush.bf16.msrb.mxu0 %v2601_v1  ;;  %v343_v36 = vunpack.c.h.bf16 %v274_v2  ;;  %v345_v37 = vunpack.c.h.bf16 %v275_v5  ;;  %v375_v21 = vunpack.c.h.bf16 %v290_v6  ;;  %v3125_v60 = vld [vmem:[%s4671_s2 + $0x18c] sm:$0xf]  ;;  %v2698_v63 = vld [vmem:[%s4671_s2 + $0x198] sm:$0xf0]  ;;  %v2568_v0 = vld [vmem:[%s4671_s2 + $0x88] sm:$0xf] }
  0x3e   : > { %1246 = vmatpush.bf16.msrb.mxu1 %v2729_v4  ;;  %v377_v22 = vunpack.c.h.bf16 %v291_v7  ;;  %v3671_v40 = vpack.c.bf16 %v564_v9, %v562_v8  ;;  %v563_v41 = vmul.f32 0.25, %v479_v10  ;;  %v406_v45 = vunpack.c.l.bf16 %v306_v13  ;;  %v3095_v1 = vld [vmem:[%s4671_s2 + $0x94] sm:$0xf0]  ;;  %v276_v2 = vld [vmem:[%s3278_s25 + $0x30] sm:$0xff]  ;;  %v2696_v3 = vld [vmem:[%s4671_s2 + $0x188] sm:$0xf] }
  0x3f   : > { %v565_v42 = vmul.f32 0.25, %v485_v11  ;;  %v408_v46 = vunpack.c.l.bf16 %v307_v14  ;;  %v486_v17 = vadd.f32 %v374_v20, %v342_v15  ;;  %v492_v18 = vadd.f32 %v376_v31, %v344_v16  ;;  %v3127_v4 = vld [vmem:[%s4671_s2 + $0x194] sm:$0xf0]  ;;  %v292_v8 = vld [vmem:[%s3278_s25 + $0xb0] sm:$0xff] }
  0x40   : > { %v407_v24 = vunpack.c.h.bf16 %v306_v13  ;;  %v2589_v27 = vor.u32 %v3097_v32, %v2586_v34  ;;  %v2717_v28 = vor.u32 %v3129_v35, %v2714_v38  ;;  %v2585_v25 = vor.u32 %v3099_v26, %v2584_v39  ;;  %v277_v7 = vld [vmem:[%s3278_s25 + $0x38] sm:$0xff]  ;;  %v308_v20 = vld [vmem:[%s3278_s25 + $0x130] sm:$0xff] }
  0x41   : > { %v409_v29 = vunpack.c.h.bf16 %v307_v14  ;;  %v489_v30 = vadd.f32 %v375_v21, %v343_v36  ;;  %v495_v47 = vadd.f32 %v377_v22, %v345_v37  ;;  %v2713_v48 = vor.u32 %v3131_v44, %v2712_v43  ;;  %v293_v9 = vld [vmem:[%s3278_s25 + $0xb8] sm:$0xff] }
  0x42   : > { %v3681_v49 = vpack.c.bf16 %v565_v42, %v563_v41  ;;  %1296 = vmatpush.bf16.msrb.mxu2 %v2589_v27  ;;  %1345 = vmatpush.bf16.msrb.mxu3 %v2717_v28  ;;  %v438_v50 = vunpack.c.l.bf16 %v322_v19  ;;  %v440_v51 = vunpack.c.l.bf16 %v323_v23  ;;  %v487_v52 = vadd.f32 %v486_v17, %v406_v45  ;;  %v309_v21 = vld [vmem:[%s3278_s25 + $0x138] sm:$0xff]  ;;  %v324_v17 = vld [vmem:[%s3278_s25 + $0x1b0] sm:$0xff] }
  0x43   : > { %v493_v53 = vadd.f32 %v492_v18, %v408_v46  ;;  %1198 = vmatpush.bf16.msrb.mxu0 %v2585_v25  ;;  %1247 = vmatpush.bf16.msrb.mxu1 %v2713_v48  ;;  %v439_v54 = vunpack.c.h.bf16 %v322_v19  ;;  %v441_v55 = vunpack.c.h.bf16 %v323_v23  ;;  %v490_v56 = vadd.f32 %v489_v30, %v407_v24  ;;  %v325_v18 = vld [vmem:[%s3278_s25 + $0x1b8] sm:$0xff] }
  0x44   : > { %v496_v57 = vadd.f32 %v495_v47, %v409_v29  ;;  %v488_v61 = vadd.f32 %v487_v52, %v438_v50  ;;  %v2573_v10 = vor.u32 %v3093_v58, %v2570_v59  ;;  %v2701_v11 = vor.u32 %v3125_v60, %v2698_v63  ;;  %v278_v52 = vld [vmem:[%s3278_s25 + $0x40] sm:$0xff]  ;;  %v2682_v59 = vld [vmem:[%s4671_s2 + $0x178] sm:$0xf0]  ;;  %v2552_v60 = vld [vmem:[%s4671_s2 + $0x68] sm:$0xf] }
  0x45   : > { %v494_v62 = vadd.f32 %v493_v53, %v440_v51  ;;  %v491_v5 = vadd.f32 %v490_v56, %v439_v54  ;;  %v2569_v13 = vor.u32 %v3095_v1, %v2568_v0  ;;  %v2697_v14 = vor.u32 %v3127_v4, %v2696_v3  ;;  %v279_v53 = vld [vmem:[%s3278_s25 + $0x48] sm:$0xff]  ;;  %v294_v54 = vld [vmem:[%s3278_s25 + $0xc0] sm:$0xff]  ;;  %v2554_v56 = vld [vmem:[%s4671_s2 + $0x78] sm:$0xf0] }
  0x46   : > { %v497_v6 = vadd.f32 %v496_v57, %v441_v55  ;;  %v566_v15 = vmul.f32 0.25, %v488_v61  ;;  %1297 = vmatpush.bf16.msrb.mxu2 %v2573_v10  ;;  %v346_v31 = vunpack.c.l.bf16 %v276_v2  ;;  %v348_v32 = vunpack.c.l.bf16 %v277_v7  ;;  %1346 = vmatpush.bf16.msrb.mxu3 %v2701_v11  ;;  %v3089_v55 = vld [vmem:[%s4671_s2 + $0x6c] sm:$0xf]  ;;  %v3091_v61 = vld [vmem:[%s4671_s2 + $0x74] sm:$0xf0] }
  0x47   : > { %1111 = vmatmul.bf16.gmra.mxu2 %v3671_v40  ;;  %v568_v16 = vmul.f32 0.25, %v494_v62  ;;  %v378_v34 = vunpack.c.l.bf16 %v292_v8  ;;  %v380_v35 = vunpack.c.l.bf16 %v293_v9  ;;  %1199 = vmatpush.bf16.msrb.mxu0 %v2569_v13  ;;  %v567_v36 = vmul.f32 0.25, %v491_v5  ;;  %v3121_v57 = vld [vmem:[%s4671_s2 + $0x16c] sm:$0xf]  ;;  %v2680_v3 = vld [vmem:[%s4671_s2 + $0x168] sm:$0xf] }
  0x48   : > { %1013 = vmatmul.bf16.gmra.mxu0 %v3671_v40  ;;  %v569_v37 = vmul.f32 0.25, %v497_v6  ;;  %1248 = vmatpush.bf16.msrb.mxu1 %v2697_v14  ;;  %v347_v22 = vunpack.c.h.bf16 %v276_v2  ;;  %v349_v38 = vunpack.c.h.bf16 %v277_v7  ;;  %v379_v39 = vunpack.c.h.bf16 %v292_v8  ;;  %v295_v0 = vld [vmem:[%s3278_s25 + $0xc8] sm:$0xff]  ;;  %v3123_v4 = vld [vmem:[%s4671_s2 + $0x174] sm:$0xf0] }
  0x49   : > { %v381_v26 = vunpack.c.h.bf16 %v293_v9  ;;  %v410_v41 = vunpack.c.l.bf16 %v308_v20  ;;  %v3717_v42 = vpack.c.bf16 %v568_v16, %v566_v15  ;;  %v412_v43 = vunpack.c.l.bf16 %v309_v21  ;;  %v310_v15 = vld [vmem:[%s3278_s25 + $0x140] sm:$0xff]  ;;  %v311_v16 = vld [vmem:[%s3278_s25 + $0x148] sm:$0xff] }
  0x4a   : > { %1062 = vmatmul.bf16.gmra.mxu1 %v3681_v49  ;;  %1160 = vmatmul.bf16.gmra.mxu3 %v3681_v49  ;;  %v498_v44 = vadd.f32 %v378_v34, %v346_v31  ;;  %v504_v45 = vadd.f32 %v380_v35, %v348_v32  ;;  %v3719_v46 = vpack.c.bf16 %v569_v37, %v567_v36  ;;  %v411_v19 = vunpack.c.h.bf16 %v308_v20 }
  0x4b   : > { %v413_v23 = vunpack.c.h.bf16 %v309_v21  ;;  %v501_v24 = vadd.f32 %v379_v39, %v347_v22  ;;  %v507_v27 = vadd.f32 %v381_v26, %v349_v38  ;;  %v442_v28 = vunpack.c.l.bf16 %v324_v17  ;;  %v326_v26 = vld [vmem:[%s3278_s25 + $0x1c0] sm:$0xff] }
  0x4c   : > { %v444_v25 = vunpack.c.l.bf16 %v325_v18  ;;  %v499_v29 = vadd.f32 %v498_v44, %v410_v41  ;;  %v505_v30 = vadd.f32 %v504_v45, %v412_v43  ;;  %v443_v47 = vunpack.c.h.bf16 %v324_v17  ;;  %v327_v41 = vld [vmem:[%s3278_s25 + $0x1c8] sm:$0xff] }
  0x4d   : > { %v445_v48 = vunpack.c.h.bf16 %v325_v18  ;;  %v502_v50 = vadd.f32 %v501_v24, %v411_v19  ;;  %v508_v51 = vadd.f32 %v507_v27, %v413_v23  ;;  %v2557_v58 = vor.u32 %v3089_v55, %v2554_v56  ;;  %v2536_v55 = vld [vmem:[%s4671_s2 + $0x48] sm:$0xf]  ;;  %v3087_v56 = vld [vmem:[%s4671_s2 + $0x54] sm:$0xf0] }
  0x4e   : > { %v500_v62 = vadd.f32 %v499_v29, %v442_v28  ;;  %v506_v63 = vadd.f32 %v505_v30, %v444_v25  ;;  %v2685_v1 = vor.u32 %v3121_v57, %v2682_v59  ;;  %v2553_v2 = vor.u32 %v3091_v61, %v2552_v60  ;;  %v280_v57 = vld [vmem:[%s3278_s25 + $0x50] sm:$0xff]  ;;  %v2664_v60 = vld [vmem:[%s4671_s2 + $0x148] sm:$0xf]  ;;  %v3119_v61 = vld [vmem:[%s4671_s2 + $0x154] sm:$0xf0] }
  0x4f   : > { %1298 = vmatpush.bf16.msrb.mxu2 %v2557_v58  ;;  %v2681_v5 = vor.u32 %v3123_v4, %v2680_v3  ;;  %v503_v6 = vadd.f32 %v502_v50, %v443_v47  ;;  %v509_v7 = vadd.f32 %v508_v51, %v445_v48  ;;  %v350_v8 = vunpack.c.l.bf16 %v278_v52  ;;  %v3085_v47 = vld [vmem:[%s4671_s2 + $0x4c] sm:$0xf]  ;;  %v2538_v48 = vld [vmem:[%s4671_s2 + $0x58] sm:$0xf0] }
  0x50   : > { %1347 = vmatpush.bf16.msrb.mxu3 %v2685_v1  ;;  %1200 = vmatpush.bf16.msrb.mxu0 %v2553_v2  ;;  %v352_v9 = vunpack.c.l.bf16 %v279_v53  ;;  %v382_v10 = vunpack.c.l.bf16 %v294_v54  ;;  %v384_v11 = vunpack.c.l.bf16 %v295_v0  ;;  %v570_v13 = vmul.f32 0.25, %v500_v62  ;;  %v3117_v50 = vld [vmem:[%s4671_s2 + $0x14c] sm:$0xf]  ;;  %v296_v1 = vld [vmem:[%s3278_s25 + $0xd0] sm:$0xff]  ;;  %v297_v2 = vld [vmem:[%s3278_s25 + $0xd8] sm:$0xff] }
  0x51   : > { %1249 = vmatpush.bf16.msrb.mxu1 %v2681_v5  ;;  %v572_v14 = vmul.f32 0.25, %v506_v63  ;;  %v351_v20 = vunpack.c.h.bf16 %v278_v52  ;;  %v353_v31 = vunpack.c.h.bf16 %v279_v53  ;;  %v383_v32 = vunpack.c.h.bf16 %v294_v54  ;;  %v2666_v54 = vld [vmem:[%s4671_s2 + $0x158] sm:$0xf0] }
  0x52   : > { %v385_v34 = vunpack.c.h.bf16 %v295_v0  ;;  %v571_v35 = vmul.f32 0.25, %v503_v6  ;;  %v573_v36 = vmul.f32 0.25, %v509_v7  ;;  %v414_v37 = vunpack.c.l.bf16 %v310_v15  ;;  %v281_v0 = vld [vmem:[%s3278_s25 + $0x58] sm:$0xff] }
  0x53   : > { %v416_v21 = vunpack.c.l.bf16 %v311_v16  ;;  %v510_v22 = vadd.f32 %v382_v10, %v350_v8  ;;  %v516_v38 = vadd.f32 %v384_v11, %v352_v9  ;;  %v3757_v39 = vpack.c.bf16 %v572_v14, %v570_v13  ;;  %v312_v13 = vld [vmem:[%s3278_s25 + $0x150] sm:$0xff]  ;;  %v313_v14 = vld [vmem:[%s3278_s25 + $0x158] sm:$0xff] }
  0x54   : > { %v415_v43 = vunpack.c.h.bf16 %v310_v15  ;;  %v417_v44 = vunpack.c.h.bf16 %v311_v16  ;;  %v513_v45 = vadd.f32 %v383_v32, %v351_v20  ;;  %v519_v17 = vadd.f32 %v385_v34, %v353_v31 }
  0x55   : > { %v3761_v18 = vpack.c.bf16 %v573_v36, %v571_v35  ;;  %v446_v19 = vunpack.c.l.bf16 %v326_v26  ;;  %v448_v23 = vunpack.c.l.bf16 %v327_v41  ;;  %v511_v24 = vadd.f32 %v510_v22, %v414_v37  ;;  %v328_v22 = vld [vmem:[%s3278_s25 + $0x1d0] sm:$0xff] }
  0x56   : > { %v517_v27 = vadd.f32 %v516_v38, %v416_v21  ;;  %v447_v28 = vunpack.c.h.bf16 %v326_v26  ;;  %v449_v25 = vunpack.c.h.bf16 %v327_v41  ;;  %v514_v29 = vadd.f32 %v513_v45, %v415_v43  ;;  %v329_v38 = vld [vmem:[%s3278_s25 + $0x1d8] sm:$0xff] }
  0x57   : > { %1116 = vmatmul.bf16.gmra.mxu2 %v3717_v42  ;;  %v520_v30 = vadd.f32 %v519_v17, %v417_v44  ;;  %v512_v51 = vadd.f32 %v511_v24, %v446_v19  ;;  %v2541_v53 = vor.u32 %v3085_v47, %v2538_v48  ;;  %v2669_v58 = vor.u32 %v3117_v50, %v2666_v54  ;;  %v298_v47 = vld [vmem:[%s3278_s25 + $0xe0] sm:$0xff]  ;;  %v3081_v48 = vld [vmem:[%s4671_s2 + $0x2c] sm:$0xf]  ;;  %v2522_v50 = vld [vmem:[%s4671_s2 + $0x38] sm:$0xf0] }
  0x58   : > { %1018 = vmatmul.bf16.gmra.mxu0 %v3717_v42  ;;  %v518_v52 = vadd.f32 %v517_v27, %v448_v23  ;;  %v2537_v59 = vor.u32 %v3087_v56, %v2536_v55  ;;  %v515_v62 = vadd.f32 %v514_v29, %v447_v28  ;;  %v2665_v3 = vor.u32 %v3119_v61, %v2664_v60  ;;  %v282_v29 = vld [vmem:[%s3278_s25 + $0x60] sm:$0xff]  ;;  %v2520_v54 = vld [vmem:[%s4671_s2 + $0x28] sm:$0xf]  ;;  %v3083_v55 = vld [vmem:[%s4671_s2 + $0x34] sm:$0xf0] }
  0x59   : > { %v521_v63 = vadd.f32 %v520_v30, %v449_v25  ;;  %1299 = vmatpush.bf16.msrb.mxu2 %v2541_v53  ;;  %1348 = vmatpush.bf16.msrb.mxu3 %v2669_v58  ;;  %v574_v4 = vmul.f32 0.25, %v512_v51  ;;  %v354_v6 = vunpack.c.l.bf16 %v280_v57  ;;  %v356_v7 = vunpack.c.l.bf16 %v281_v0  ;;  %v283_v30 = vld [vmem:[%s3278_s25 + $0x68] sm:$0xff]  ;;  %v2650_v53 = vld [vmem:[%s4671_s2 + $0x138] sm:$0xf0] }
  0x5a   : > { %1067 = vmatmul.bf16.gmra.mxu1 %v3719_v46  ;;  %1165 = vmatmul.bf16.gmra.mxu3 %v3719_v46  ;;  %v576_v5 = vmul.f32 0.25, %v518_v52  ;;  %v386_v8 = vunpack.c.l.bf16 %v296_v1  ;;  %v388_v9 = vunpack.c.l.bf16 %v297_v2  ;;  %v575_v10 = vmul.f32 0.25, %v515_v62  ;;  %v3113_v51 = vld [vmem:[%s4671_s2 + $0x12c] sm:$0xf]  ;;  %v2648_v61 = vld [vmem:[%s4671_s2 + $0x128] sm:$0xf] }
  0x5b   : > { %1201 = vmatpush.bf16.msrb.mxu0 %v2537_v59  ;;  %1250 = vmatpush.bf16.msrb.mxu1 %v2665_v3  ;;  %v577_v11 = vmul.f32 0.25, %v521_v63  ;;  %v355_v15 = vunpack.c.h.bf16 %v280_v57  ;;  %v357_v16 = vunpack.c.h.bf16 %v281_v0  ;;  %v387_v20 = vunpack.c.h.bf16 %v296_v1  ;;  %v299_v58 = vld [vmem:[%s3278_s25 + $0xe8] sm:$0xff]  ;;  %v3115_v62 = vld [vmem:[%s4671_s2 + $0x134] sm:$0xf0] }
  0x5c   : > { %v389_v31 = vunpack.c.h.bf16 %v297_v2  ;;  %v3797_v32 = vpack.c.bf16 %v576_v5, %v574_v4  ;;  %v418_v34 = vunpack.c.l.bf16 %v312_v13  ;;  %v420_v35 = vunpack.c.l.bf16 %v313_v14 }
  0x5d   : > { %v522_v36 = vadd.f32 %v386_v8, %v354_v6  ;;  %v528_v37 = vadd.f32 %v388_v9, %v356_v7  ;;  %v3799_v21 = vpack.c.bf16 %v577_v11, %v575_v10  ;;  %v419_v26 = vunpack.c.h.bf16 %v312_v13  ;;  %v314_v8 = vld [vmem:[%s3278_s25 + $0x160] sm:$0xff]  ;;  %v315_v9 = vld [vmem:[%s3278_s25 + $0x168] sm:$0xff] }
  0x5e   : > { %v421_v41 = vunpack.c.h.bf16 %v313_v14  ;;  %v525_v43 = vadd.f32 %v387_v20, %v355_v15  ;;  %v531_v44 = vadd.f32 %v389_v31, %v357_v16  ;;  %v450_v45 = vunpack.c.l.bf16 %v328_v22 }
  0x5f   : > { %v452_v17 = vunpack.c.l.bf16 %v329_v38  ;;  %v523_v19 = vadd.f32 %v522_v36, %v418_v34  ;;  %v529_v23 = vadd.f32 %v528_v37, %v420_v35  ;;  %v451_v24 = vunpack.c.h.bf16 %v328_v22  ;;  %v330_v37 = vld [vmem:[%s3278_s25 + $0x1e0] sm:$0xff]  ;;  %v331_v22 = vld [vmem:[%s3278_s25 + $0x1e8] sm:$0xff] }
  0x60   : > { %v453_v27 = vunpack.c.h.bf16 %v329_v38  ;;  %v526_v28 = vadd.f32 %v525_v43, %v419_v26  ;;  %v532_v25 = vadd.f32 %v531_v44, %v421_v41  ;;  %v2525_v52 = vor.u32 %v3081_v48, %v2522_v50 }
  0x61   : > { %v524_v56 = vadd.f32 %v523_v19, %v450_v45  ;;  %v530_v57 = vadd.f32 %v529_v23, %v452_v17  ;;  %v2653_v59 = vor.u32 %v3113_v51, %v2650_v53  ;;  %v2521_v60 = vor.u32 %v3083_v55, %v2520_v54  ;;  %v2504_v53 = vld [vmem:[%s4671_s2 + $0x8] sm:$0xf]  ;;  %v3079_v54 = vld [vmem:[%s4671_s2 + $0x14] sm:$0xf0]  ;;  %v284_v55 = vld [vmem:[%s3278_s25 + $0x70] sm:$0xff] }
  0x62   : > { %1300 = vmatpush.bf16.msrb.mxu2 %v2525_v52  ;;  %v2649_v63 = vor.u32 %v3115_v62, %v2648_v61  ;;  %v527_v0 = vadd.f32 %v526_v28, %v451_v24  ;;  %v533_v1 = vadd.f32 %v532_v25, %v453_v27  ;;  %v358_v2 = vunpack.c.l.bf16 %v282_v29  ;;  %v2634_v52 = vld [vmem:[%s4671_s2 + $0x118] sm:$0xf0] }
  0x63   : > { %1349 = vmatpush.bf16.msrb.mxu3 %v2653_v59  ;;  %1202 = vmatpush.bf16.msrb.mxu0 %v2521_v60  ;;  %v360_v3 = vunpack.c.l.bf16 %v283_v30  ;;  %v390_v4 = vunpack.c.l.bf16 %v298_v47  ;;  %v392_v5 = vunpack.c.l.bf16 %v299_v58  ;;  %v578_v6 = vmul.f32 0.25, %v524_v56  ;;  %v3111_v59 = vld [vmem:[%s4671_s2 + $0x114] sm:$0xf0] }
  0x64   : > { %1251 = vmatpush.bf16.msrb.mxu1 %v2649_v63  ;;  %v580_v7 = vmul.f32 0.25, %v530_v57  ;;  %v359_v10 = vunpack.c.h.bf16 %v282_v29  ;;  %v361_v11 = vunpack.c.h.bf16 %v283_v30  ;;  %v391_v13 = vunpack.c.h.bf16 %v298_v47  ;;  %v3077_v29 = vld [vmem:[%s4671_s2 + $0xc] sm:$0xf]  ;;  %v2506_v30 = vld [vmem:[%s4671_s2 + $0x18] sm:$0xf0]  ;;  %v300_v63 = vld [vmem:[%s3278_s25 + $0xf0] sm:$0xff] }
  0x65   : > { %v393_v14 = vunpack.c.h.bf16 %v299_v58  ;;  %v579_v15 = vmul.f32 0.25, %v527_v0  ;;  %v581_v16 = vmul.f32 0.25, %v533_v1  ;;  %v422_v20 = vunpack.c.l.bf16 %v314_v8  ;;  %v3109_v47 = vld [vmem:[%s4671_s2 + $0x10c] sm:$0xf]  ;;  %v2632_v58 = vld [vmem:[%s4671_s2 + $0x108] sm:$0xf] }
  0x66   : > { %v424_v31 = vunpack.c.l.bf16 %v315_v9  ;;  %v534_v34 = vadd.f32 %v390_v4, %v358_v2  ;;  %v540_v35 = vadd.f32 %v392_v5, %v360_v3  ;;  %v3837_v36 = vpack.c.bf16 %v580_v7, %v578_v6  ;;  %v285_v62 = vld [vmem:[%s3278_s25 + $0x78] sm:$0xff] }
  0x67   : > { %1121 = vmatmul.bf16.gmra.mxu2 %v3757_v39  ;;  %v423_v38 = vunpack.c.h.bf16 %v314_v8  ;;  %v425_v26 = vunpack.c.h.bf16 %v315_v9  ;;  %v537_v41 = vadd.f32 %v391_v13, %v359_v10  ;;  %v543_v43 = vadd.f32 %v393_v14, %v361_v11  ;;  %v301_v0 = vld [vmem:[%s3278_s25 + $0xf8] sm:$0xff]  ;;  %v316_v10 = vld [vmem:[%s3278_s25 + $0x170] sm:$0xff] }
  0x68   : > { %1023 = vmatmul.bf16.gmra.mxu0 %v3757_v39  ;;  %v3841_v44 = vpack.c.bf16 %v581_v16, %v579_v15  ;;  %v454_v45 = vunpack.c.l.bf16 %v330_v37  ;;  %v456_v17 = vunpack.c.l.bf16 %v331_v22  ;;  %v535_v19 = vadd.f32 %v534_v34, %v422_v20  ;;  %v317_v11 = vld [vmem:[%s3278_s25 + $0x178] sm:$0xff] }
  0x69   : > { %v541_v23 = vadd.f32 %v540_v35, %v424_v31  ;;  %v455_v24 = vunpack.c.h.bf16 %v330_v37  ;;  %v457_v27 = vunpack.c.h.bf16 %v331_v22  ;;  %v538_v28 = vadd.f32 %v537_v41, %v423_v38  ;;  %v332_v38 = vld [vmem:[%s3278_s25 + $0x1f0] sm:$0xff] }
  0x6a   : > { %1072 = vmatmul.bf16.gmra.mxu1 %v3761_v18  ;;  %1170 = vmatmul.bf16.gmra.mxu3 %v3761_v18  ;;  %v544_v25 = vadd.f32 %v543_v43, %v425_v26  ;;  %v536_v48 = vadd.f32 %v535_v19, %v454_v45  ;;  %v2509_v51 = vor.u32 %v3077_v29, %v2506_v30  ;;  %v362_v4 = vunpack.c.l.bf16 %v284_v55  ;;  %v333_v26 = vld [vmem:[%s3278_s25 + $0x1f8] sm:$0xff] }
  0x6b   : > { %v542_v50 = vadd.f32 %v541_v23, %v456_v17  ;;  %v2637_v56 = vor.u32 %v3109_v47, %v2634_v52  ;;  %v2505_v57 = vor.u32 %v3079_v54, %v2504_v53  ;;  %v539_v60 = vadd.f32 %v538_v28, %v455_v24 }
  0x6c   : > { %v545_v61 = vadd.f32 %v544_v25, %v457_v27  ;;  %1301 = vmatpush.bf16.msrb.mxu2 %v2509_v51  ;;  %v2633_v1 = vor.u32 %v3111_v59, %v2632_v58  ;;  %v582_v2 = vmul.f32 0.25, %v536_v48  ;;  %v364_v5 = vunpack.c.l.bf16 %v285_v62  ;;  %v3898_v58 = vld [vmem:[%s4672_s3] sm:$0xf] }
  0x6d   : > { %1350 = vmatpush.bf16.msrb.mxu3 %v2637_v56  ;;  %1203 = vmatpush.bf16.msrb.mxu0 %v2505_v57  ;;  %v584_v3 = vmul.f32 0.25, %v542_v50  ;;  %v394_v6 = vunpack.c.l.bf16 %v300_v63  ;;  %v396_v7 = vunpack.c.l.bf16 %v301_v0  ;;  %v583_v8 = vmul.f32 0.25, %v539_v60 }
  0x6e   : > { %1252 = vmatpush.bf16.msrb.mxu1 %v2633_v1  ;;  %v585_v9 = vmul.f32 0.25, %v545_v61  ;;  %v363_v13 = vunpack.c.h.bf16 %v284_v55  ;;  %v365_v14 = vunpack.c.h.bf16 %v285_v62  ;;  %v395_v15 = vunpack.c.h.bf16 %v300_v63 }
  0x6f   : > { %v397_v16 = vunpack.c.h.bf16 %v301_v0  ;;  %v3877_v20 = vpack.c.bf16 %v584_v3, %v582_v2  ;;  %v426_v31 = vunpack.c.l.bf16 %v316_v10  ;;  %v428_v34 = vunpack.c.l.bf16 %v317_v11 }
  0x70   : > { %v546_v35 = vadd.f32 %v394_v6, %v362_v4  ;;  %v552_v37 = vadd.f32 %v396_v7, %v364_v5  ;;  %v3879_v22 = vpack.c.bf16 %v585_v9, %v583_v8  ;;  %v427_v41 = vunpack.c.h.bf16 %v316_v10 }
  0x71   : > { %v429_v43 = vunpack.c.h.bf16 %v317_v11  ;;  %v549_v45 = vadd.f32 %v395_v15, %v363_v13  ;;  %v555_v17 = vadd.f32 %v397_v16, %v365_v14  ;;  %v458_v19 = vunpack.c.l.bf16 %v332_v38 }
  0x72   : > { %v460_v23 = vunpack.c.l.bf16 %v333_v26  ;;  %v547_v24 = vadd.f32 %v546_v35, %v426_v31  ;;  %v553_v27 = vadd.f32 %v552_v37, %v428_v34  ;;  %v459_v28 = vunpack.c.h.bf16 %v332_v38 }
  0x73   : > { %v461_v25 = vunpack.c.h.bf16 %v333_v26  ;;  %v550_v29 = vadd.f32 %v549_v45, %v427_v41  ;;  %v556_v30 = vadd.f32 %v555_v17, %v429_v43  ;;  %v3901_v59 = vperm.slane %v3898_v58, 0 }
  0x74   : > { %v548_v47 = vadd.f32 %v547_v24, %v458_v19  ;;  %v554_v48 = vadd.f32 %v553_v27, %v460_v23  ;;  %v3907_v63 = vperm.slane %v3898_v58, 1 }
  0x75   : > { %v551_v50 = vadd.f32 %v550_v29, %v459_v28  ;;  %v557_v51 = vadd.f32 %v556_v30, %v461_v25 }
  0x76   : > { %v586_v52 = vmul.f32 0.25, %v548_v47  ;;  %v588_v53 = vmul.f32 0.25, %v554_v48 }
  0x77   : > { %1126 = vmatmul.bf16.gmra.mxu2 %v3797_v32  ;;  %v587_v54 = vmul.f32 0.25, %v551_v50  ;;  %v589_v55 = vmul.f32 0.25, %v557_v51 }
  0x78   : > { %1028 = vmatmul.bf16.gmra.mxu0 %v3797_v32  ;;  %v3887_v56 = vpack.c.bf16 %v588_v53, %v586_v52 }
  0x79   : > { %v3889_v57 = vpack.c.bf16 %v589_v55, %v587_v54 }
  0x7a   : > { %1077 = vmatmul.bf16.gmra.mxu1 %v3799_v21  ;;  %1175 = vmatmul.bf16.gmra.mxu3 %v3799_v21 }
  0x87   : > { %1131 = vmatmul.bf16.gmra.mxu2 %v3837_v36 }
  0x88   : > { %1033 = vmatmul.bf16.gmra.mxu0 %v3837_v36 }
  0x8a   : > { %1082 = vmatmul.bf16.gmra.mxu1 %v3841_v44  ;;  %1180 = vmatmul.bf16.gmra.mxu3 %v3841_v44 }
  0x97   : > { %1136 = vmatmul.bf16.gmra.mxu2 %v3877_v20 }
  0x98   : > { %1038 = vmatmul.bf16.gmra.mxu0 %v3877_v20 }
  0x9a   : > { %1087 = vmatmul.bf16.gmra.mxu1 %v3879_v22  ;;  %1185 = vmatmul.bf16.gmra.mxu3 %v3879_v22 }
  0xa7   : > { %1141 = vmatmul.bf16.gmra.mxu2 %v3887_v56 }
  0xa8   : > { %1043 = vmatmul.bf16.gmra.mxu0 %v3887_v56 }
  0xaa   : > { %1092 = vmatmul.bf16.gmra.mxu1 %v3889_v57  ;;  %1190 = vmatmul.bf16.gmra.mxu3 %v3889_v57 }
  0xb5   : > { %v1009_v60 = vpop.f32.mrf.mxu0 }
  0xb6   : > { %v1010_v62 = vadd.f32 %v1009_v60, %v3901_v59 }
  0xb7   : > { %v1058_v61 = vpop.f32.mrf.mxu1  ;;  %1302 = vmatmul.bf16.vlgmr.msrb.gmra.mxu2 %v3610_v12 }
  0xb8   : > { %1204 = vmatmul.bf16.vlgmr.msrb.gmra.mxu0 %v3610_v12  ;;  %v1059_v1 = vadd.f32 %v1058_v61, %v1010_v62 }
  0xba   : > { %1253 = vmatmul.bf16.vlgmr.msrb.gmra.mxu1 %v3625_v33  ;;  %1351 = vmatmul.bf16.vlgmr.msrb.gmra.mxu3 %v3625_v33  ;;  %v1107_v0 = vpop.f32.mrf.mxu2 }
  0xbb   : > { %v1108_v2 = vadd.f32 %v1107_v0, %v3907_v63 }
  0xbd   : > { %v1156_v3 = vpop.f32.mrf.mxu3  ;;  %v1011_v4 = vpop.f32.mrf.mxu0 }
  0xbe   : > { %v1157_v5 = vadd.f32 %v1156_v3, %v1108_v2  ;;  %v1012_v12 = vadd.f32 %v1011_v4, %v3901_v59 }
  0xbf   : > { %v1060_v6 = vpop.f32.mrf.mxu1 }
  0xc0   : > { %v1392_v7 = vpack.c.bf16 %v1157_v5, %v1059_v1  ;;  %v1061_v13 = vadd.f32 %v1060_v6, %v1012_v12 }
  0xc2   : > { %1424 = vst [vmem:[%s3288_s7] sm:$0xff] %v1392_v7  ;;  %v1109_v8 = vpop.f32.mrf.mxu2 }
  0xc3   : > { %v1110_v9 = vadd.f32 %v1109_v8, %v3907_v63 }
  0xc5   : > { %v1158_v10 = vpop.f32.mrf.mxu3  ;;  %v1014_v11 = vpop.f32.mrf.mxu0 }
  0xc6   : > { %v1159_v33 = vadd.f32 %v1158_v10, %v1110_v9  ;;  %v1015_v16 = vadd.f32 %v1014_v11, %v3901_v59 }
  0xc7   : > { %v1063_v14 = vpop.f32.mrf.mxu1  ;;  %1307 = vmatmul.bf16.gmra.mxu2 %v3671_v40 }
  0xc8   : > { %v1394_v15 = vpack.c.bf16 %v1159_v33, %v1061_v13  ;;  %1209 = vmatmul.bf16.gmra.mxu0 %v3671_v40  ;;  %v1064_v34 = vadd.f32 %v1063_v14, %v1015_v16 }
  0xca   : > { %1426 = vst [vmem:[%s3288_s7 + $0x10] sm:$0xff] %v1394_v15  ;;  %1258 = vmatmul.bf16.gmra.mxu1 %v3681_v49  ;;  %1356 = vmatmul.bf16.gmra.mxu3 %v3681_v49  ;;  %v1112_v31 = vpop.f32.mrf.mxu2 }
  0xcb   : > { %v1113_v35 = vadd.f32 %v1112_v31, %v3907_v63 }
  0xcd   : > { %v1161_v37 = vpop.f32.mrf.mxu3  ;;  %v1016_v38 = vpop.f32.mrf.mxu0 }
  0xce   : > { %v1162_v26 = vadd.f32 %v1161_v37, %v1113_v35  ;;  %v1017_v45 = vadd.f32 %v1016_v38, %v3901_v59 }
  0xcf   : > { %v1065_v41 = vpop.f32.mrf.mxu1 }
  0xd0   : > { %v1396_v43 = vpack.c.bf16 %v1162_v26, %v1064_v34  ;;  %v1066_v24 = vadd.f32 %v1065_v41, %v1017_v45 }
  0xd2   : > { %1428 = vst [vmem:[%s3288_s7 + $0x20] sm:$0xff] %v1396_v43  ;;  %v1114_v17 = vpop.f32.mrf.mxu2 }
  0xd3   : > { %v1115_v40 = vadd.f32 %v1114_v17, %v3907_v63 }
  0xd5   : > { %v1163_v19 = vpop.f32.mrf.mxu3  ;;  %v1019_v23 = vpop.f32.mrf.mxu0 }
  0xd6   : > { %v1164_v49 = vadd.f32 %v1163_v19, %v1115_v40  ;;  %v1020_v25 = vadd.f32 %v1019_v23, %v3901_v59 }
  0xd7   : > { %v1068_v27 = vpop.f32.mrf.mxu1  ;;  %1312 = vmatmul.bf16.gmra.mxu2 %v3717_v42 }
  0xd8   : > { %v1398_v28 = vpack.c.bf16 %v1164_v49, %v1066_v24  ;;  %1214 = vmatmul.bf16.gmra.mxu0 %v3717_v42  ;;  %v1069_v30 = vadd.f32 %v1068_v27, %v1020_v25 }
  0xda   : > { %1430 = vst [vmem:[%s3288_s7 + $0x30] sm:$0xff] %v1398_v28  ;;  %1263 = vmatmul.bf16.gmra.mxu1 %v3719_v46  ;;  %1361 = vmatmul.bf16.gmra.mxu3 %v3719_v46  ;;  %v1117_v29 = vpop.f32.mrf.mxu2 }
  0xdb   : > { %v1118_v47 = vadd.f32 %v1117_v29, %v3907_v63 }
  0xdd   : > { %v1166_v48 = vpop.f32.mrf.mxu3  ;;  %v1021_v50 = vpop.f32.mrf.mxu0 }
  0xde   : > { %v1167_v51 = vadd.f32 %v1166_v48, %v1118_v47  ;;  %v1022_v54 = vadd.f32 %v1021_v50, %v3901_v59 }
  0xdf   : > { %v1070_v52 = vpop.f32.mrf.mxu1 }
  0xe0   : > { %v1400_v53 = vpack.c.bf16 %v1167_v51, %v1069_v30  ;;  %v1071_v62 = vadd.f32 %v1070_v52, %v1022_v54 }
  0xe2   : > { %1432 = vst [vmem:[%s3288_s7 + $0x40] sm:$0xff] %v1400_v53  ;;  %v1119_v55 = vpop.f32.mrf.mxu2 }
  0xe3   : > { %v1120_v42 = vadd.f32 %v1119_v55, %v3907_v63 }
  0xe5   : > { %v1168_v60 = vpop.f32.mrf.mxu3  ;;  %v1024_v61 = vpop.f32.mrf.mxu0 }
  0xe6   : > { %v1169_v46 = vadd.f32 %v1168_v60, %v1120_v42  ;;  %v1025_v2 = vadd.f32 %v1024_v61, %v3901_v59 }
  0xe7   : > { %v1073_v0 = vpop.f32.mrf.mxu1  ;;  %1317 = vmatmul.bf16.gmra.mxu2 %v3757_v39 }
  0xe8   : > { %v1402_v1 = vpack.c.bf16 %v1169_v46, %v1071_v62  ;;  %1219 = vmatmul.bf16.gmra.mxu0 %v3757_v39  ;;  %v1074_v4 = vadd.f32 %v1073_v0, %v1025_v2 }
  0xea   : > { %1434 = vst [vmem:[%s3288_s7 + $0x50] sm:$0xff] %v1402_v1  ;;  %1268 = vmatmul.bf16.gmra.mxu1 %v3761_v18  ;;  %1366 = vmatmul.bf16.gmra.mxu3 %v3761_v18  ;;  %v1122_v3 = vpop.f32.mrf.mxu2 }
  0xeb   : > { %v1123_v5 = vadd.f32 %v1122_v3, %v3907_v63 }
  0xed   : > { %v1171_v6 = vpop.f32.mrf.mxu3  ;;  %v1026_v7 = vpop.f32.mrf.mxu0 }
  0xee   : > { %v1172_v12 = vadd.f32 %v1171_v6, %v1123_v5  ;;  %v1027_v10 = vadd.f32 %v1026_v7, %v3901_v59 }
  0xef   : > { %v1075_v8 = vpop.f32.mrf.mxu1 }
  0xf0   : > { %v1404_v9 = vpack.c.bf16 %v1172_v12, %v1074_v4  ;;  %v1076_v14 = vadd.f32 %v1075_v8, %v1027_v10 }
  0xf2   : > { %1436 = vst [vmem:[%s3288_s7 + $0x60] sm:$0xff] %v1404_v9  ;;  %v1124_v11 = vpop.f32.mrf.mxu2 }
  0xf3   : > { %v1125_v39 = vadd.f32 %v1124_v11, %v3907_v63 }
  0xf5   : > { %v1173_v13 = vpop.f32.mrf.mxu3  ;;  %v1029_v33 = vpop.f32.mrf.mxu0 }
  0xf6   : > { %v1174_v18 = vadd.f32 %v1173_v13, %v1125_v39  ;;  %v1030_v31 = vadd.f32 %v1029_v33, %v3901_v59 }
  0xf7   : > { %v1078_v15 = vpop.f32.mrf.mxu1  ;;  %1322 = vmatmul.bf16.gmra.mxu2 %v3797_v32 }
  0xf8   : > { %v1406_v16 = vpack.c.bf16 %v1174_v18, %v1076_v14  ;;  %1224 = vmatmul.bf16.gmra.mxu0 %v3797_v32  ;;  %v1079_v35 = vadd.f32 %v1078_v15, %v1030_v31 }
  0xfa   : > { %1438 = vst [vmem:[%s3288_s7 + $0x70] sm:$0xff] %v1406_v16  ;;  %1273 = vmatmul.bf16.gmra.mxu1 %v3799_v21  ;;  %1371 = vmatmul.bf16.gmra.mxu3 %v3799_v21  ;;  %v1127_v34 = vpop.f32.mrf.mxu2 }
  0xfb   : > { %v1128_v37 = vadd.f32 %v1127_v34, %v3907_v63 }
  0xfd   : > { %v1176_v38 = vpop.f32.mrf.mxu3  ;;  %v1031_v26 = vpop.f32.mrf.mxu0 }
  0xfe   : > { %v1177_v41 = vadd.f32 %v1176_v38, %v1128_v37  ;;  %v1032_v17 = vadd.f32 %v1031_v26, %v3901_v59 }
  0xff   : > { %v1080_v43 = vpop.f32.mrf.mxu1 }
 0x100   : > { %v1408_v45 = vpack.c.bf16 %v1177_v41, %v1079_v35  ;;  %v1081_v24 = vadd.f32 %v1080_v43, %v1032_v17  ;;  %v3986_v41 = vperm.slane %v3898_v58, 2 }
 0x102   : > { %1440 = vst [vmem:[%s3288_s7 + $0x80] sm:$0xff] %v1408_v45  ;;  %v1129_v40 = vpop.f32.mrf.mxu2 }
 0x103   : > { %v1130_v32 = vadd.f32 %v1129_v40, %v3907_v63 }
 0x105   : > { %v1178_v19 = vpop.f32.mrf.mxu3  ;;  %v1034_v23 = vpop.f32.mrf.mxu0 }
 0x106   : > { %v1179_v21 = vadd.f32 %v1178_v19, %v1130_v32  ;;  %v1035_v28 = vadd.f32 %v1034_v23, %v3901_v59  ;;  %v3990_v23 = vperm.slane %v3898_v58, 3 }
 0x107   : > { %v1083_v49 = vpop.f32.mrf.mxu1  ;;  %1327 = vmatmul.bf16.gmra.mxu2 %v3837_v36 }
 0x108   : > { %v1410_v27 = vpack.c.bf16 %v1179_v21, %v1081_v24  ;;  %1229 = vmatmul.bf16.gmra.mxu0 %v3837_v36  ;;  %v1084_v29 = vadd.f32 %v1083_v49, %v1035_v28 }
 0x10a   : > { %1442 = vst [vmem:[%s3288_s7 + $0x90] sm:$0xff] %v1410_v27  ;;  %1278 = vmatmul.bf16.gmra.mxu1 %v3841_v44  ;;  %1376 = vmatmul.bf16.gmra.mxu3 %v3841_v44  ;;  %v1132_v25 = vpop.f32.mrf.mxu2 }
 0x10b   : > { %v1133_v30 = vadd.f32 %v1132_v25, %v3907_v63 }
 0x10d   : > { %v1181_v47 = vpop.f32.mrf.mxu3  ;;  %v1036_v48 = vpop.f32.mrf.mxu0 }
 0x10e   : > { %v1182_v50 = vadd.f32 %v1181_v47, %v1133_v30  ;;  %v1037_v53 = vadd.f32 %v1036_v48, %v3901_v59 }
 0x10f   : > { %v1085_v51 = vpop.f32.mrf.mxu1 }
 0x110   : > { %v1412_v52 = vpack.c.bf16 %v1182_v50, %v1084_v29  ;;  %v1086_v60 = vadd.f32 %v1085_v51, %v1037_v53 }
 0x112   : > { %1444 = vst [vmem:[%s3288_s7 + $0xa0] sm:$0xff] %v1412_v52  ;;  %v1134_v54 = vpop.f32.mrf.mxu2 }
 0x113   : > { %v1135_v36 = vadd.f32 %v1134_v54, %v3907_v63 }
 0x115   : > { %v1183_v55 = vpop.f32.mrf.mxu3  ;;  %v1039_v42 = vpop.f32.mrf.mxu0 }
 0x116   : > { %v1184_v44 = vadd.f32 %v1183_v55, %v1135_v36  ;;  %v1040_v46 = vadd.f32 %v1039_v42, %v3901_v59 }
 0x117   : > { %v1088_v61 = vpop.f32.mrf.mxu1  ;;  %1332 = vmatmul.bf16.gmra.mxu2 %v3877_v20 }
 0x118   : > { %v1414_v62 = vpack.c.bf16 %v1184_v44, %v1086_v60  ;;  %1234 = vmatmul.bf16.gmra.mxu0 %v3877_v20  ;;  %v1089_v1 = vadd.f32 %v1088_v61, %v1040_v46 }
 0x11a   : > { %1446 = vst [vmem:[%s3288_s7 + $0xb0] sm:$0xff] %v1414_v62  ;;  %1283 = vmatmul.bf16.gmra.mxu1 %v3879_v22  ;;  %1381 = vmatmul.bf16.gmra.mxu3 %v3879_v22  ;;  %v1137_v0 = vpop.f32.mrf.mxu2 }
 0x11b   : > { %v1138_v2 = vadd.f32 %v1137_v0, %v3907_v63 }
 0x11d   : > { %v1186_v3 = vpop.f32.mrf.mxu3  ;;  %v1041_v4 = vpop.f32.mrf.mxu0 }
 0x11e   : > { %v1187_v5 = vadd.f32 %v1186_v3, %v1138_v2  ;;  %v1042_v12 = vadd.f32 %v1041_v4, %v3901_v59 }
 0x11f   : > { %v1090_v6 = vpop.f32.mrf.mxu1 }
 0x120   : > { %v1416_v7 = vpack.c.bf16 %v1187_v5, %v1089_v1  ;;  %v1091_v11 = vadd.f32 %v1090_v6, %v1042_v12 }
 0x122   : > { %1448 = vst [vmem:[%s3288_s7 + $0xc0] sm:$0xff] %v1416_v7  ;;  %v1139_v8 = vpop.f32.mrf.mxu2 }
 0x123   : > { %v1140_v20 = vadd.f32 %v1139_v8, %v3907_v63 }
 0x125   : > { %v1188_v9 = vpop.f32.mrf.mxu3  ;;  %v1044_v10 = vpop.f32.mrf.mxu0 }
 0x126   : > { %v1189_v22 = vadd.f32 %v1188_v9, %v1140_v20  ;;  %v1045_v33 = vadd.f32 %v1044_v10, %v3901_v59 }
 0x127   : > { %v1093_v39 = vpop.f32.mrf.mxu1  ;;  %1337 = vmatmul.bf16.gmra.mxu2 %v3887_v56 }
 0x128   : > { %v1418_v13 = vpack.c.bf16 %v1189_v22, %v1091_v11  ;;  %1239 = vmatmul.bf16.gmra.mxu0 %v3887_v56  ;;  %v1094_v18 = vadd.f32 %v1093_v39, %v1045_v33 }
 0x12a   : > { %1450 = vst [vmem:[%s3288_s7 + $0xd0] sm:$0xff] %v1418_v13  ;;  %1288 = vmatmul.bf16.gmra.mxu1 %v3889_v57  ;;  %1386 = vmatmul.bf16.gmra.mxu3 %v3889_v57  ;;  %v1142_v14 = vpop.f32.mrf.mxu2 }
 0x12b   : > { %v1143_v15 = vadd.f32 %v1142_v14, %v3907_v63 }
 0x12d   : > { %v1191_v16 = vpop.f32.mrf.mxu3  ;;  %v1046_v31 = vpop.f32.mrf.mxu0 }
 0x12e   : > { %v1192_v34 = vadd.f32 %v1191_v16, %v1143_v15  ;;  %v1047_v38 = vadd.f32 %v1046_v31, %v3901_v59 }
 0x12f   : > { %v1095_v35 = vpop.f32.mrf.mxu1 }
 0x130   : > { %v1420_v37 = vpack.c.bf16 %v1192_v34, %v1094_v18  ;;  %v1096_v45 = vadd.f32 %v1095_v35, %v1047_v38 }
 0x132   : > { %1452 = vst [vmem:[%s3288_s7 + $0xe0] sm:$0xff] %v1420_v37  ;;  %v1144_v26 = vpop.f32.mrf.mxu2 }
 0x133   : > { %v1145_v56 = vadd.f32 %v1144_v26, %v3907_v63 }
 0x135   : > { %v1193_v57 = vpop.f32.mrf.mxu3  ;;  %v1205_v43 = vpop.f32.mrf.mxu0 }
 0x136   : > { %v1194_v17 = vadd.f32 %v1193_v57, %v1145_v56  ;;  %v1206_v19 = vadd.f32 %v1205_v43, %v3986_v41 }
 0x137   : > { %v1254_v40 = vpop.f32.mrf.mxu1 }
 0x138   : > { %v1422_v32 = vpack.c.bf16 %v1194_v17, %v1096_v45  ;;  %v1255_v24 = vadd.f32 %v1254_v40, %v1206_v19 }
 0x13a   : > { %1454 = vst [vmem:[%s3288_s7 + $0xf0] sm:$0xff] %v1422_v32  ;;  %v1303_v59 = vpop.f32.mrf.mxu2 }
 0x13b   : > { %v1304_v63 = vadd.f32 %v1303_v59, %v3990_v23 }
 0x13d   : > { %v1352_v21 = vpop.f32.mrf.mxu3  ;;  %v1207_v49 = vpop.f32.mrf.mxu0 }
 0x13e   : > { %v1353_v27 = vadd.f32 %v1352_v21, %v1304_v63  ;;  %v1208_v29 = vadd.f32 %v1207_v49, %v3986_v41 }
 0x13f   : > { %v1256_v28 = vpop.f32.mrf.mxu1 }
 0x140   : > { %v1393_v25 = vpack.c.bf16 %v1353_v27, %v1255_v24  ;;  %v1257_v50 = vadd.f32 %v1256_v28, %v1208_v29 }
 0x142   : > { %1425 = vst [vmem:[%s3288_s7 + $0x8] sm:$0xff] %v1393_v25  ;;  %v1305_v30 = vpop.f32.mrf.mxu2 }
 0x143   : > { %v1306_v47 = vadd.f32 %v1305_v30, %v3990_v23 }
 0x145   : > { %v1354_v48 = vpop.f32.mrf.mxu3  ;;  %v1210_v58 = vpop.f32.mrf.mxu0 }
 0x146   : > { %v1355_v51 = vadd.f32 %v1354_v48, %v1306_v47  ;;  %v1211_v54 = vadd.f32 %v1210_v58, %v3986_v41 }
 0x147   : > { %v1259_v52 = vpop.f32.mrf.mxu1 }
 0x148   : > { %v1395_v53 = vpack.c.bf16 %v1355_v51, %v1257_v50  ;;  %v1260_v55 = vadd.f32 %v1259_v52, %v1211_v54 }
 0x14a   : > { %1427 = vst [vmem:[%s3288_s7 + $0x18] sm:$0xff] %v1395_v53  ;;  %v1308_v36 = vpop.f32.mrf.mxu2 }
 0x14b   : > { %v1309_v42 = vadd.f32 %v1308_v36, %v3990_v23 }
 0x14d   : > { %v1357_v60 = vpop.f32.mrf.mxu3  ;;  %v1212_v44 = vpop.f32.mrf.mxu0 }
 0x14e   : > { %v1358_v61 = vadd.f32 %v1357_v60, %v1309_v42  ;;  %v1213_v0 = vadd.f32 %v1212_v44, %v3986_v41 }
 0x14f   : > { %v1261_v62 = vpop.f32.mrf.mxu1 }
 0x150   : > { %v1397_v46 = vpack.c.bf16 %v1358_v61, %v1260_v55  ;;  %v1262_v5 = vadd.f32 %v1261_v62, %v1213_v0 }
 0x152   : > { %1429 = vst [vmem:[%s3288_s7 + $0x28] sm:$0xff] %v1397_v46  ;;  %v1310_v1 = vpop.f32.mrf.mxu2 }
 0x153   : > { %v1311_v2 = vadd.f32 %v1310_v1, %v3990_v23 }
 0x155   : > { %v1359_v3 = vpop.f32.mrf.mxu3  ;;  %v1215_v4 = vpop.f32.mrf.mxu0 }
 0x156   : > { %v1360_v6 = vadd.f32 %v1359_v3, %v1311_v2  ;;  %v1216_v8 = vadd.f32 %v1215_v4, %v3986_v41 }
 0x157   : > { %v1264_v7 = vpop.f32.mrf.mxu1 }
 0x158   : > { %v1399_v12 = vpack.c.bf16 %v1360_v6, %v1262_v5  ;;  %v1265_v9 = vadd.f32 %v1264_v7, %v1216_v8 }
 0x15a   : > { %1431 = vst [vmem:[%s3288_s7 + $0x38] sm:$0xff] %v1399_v12  ;;  %v1313_v20 = vpop.f32.mrf.mxu2 }
 0x15b   : > { %v1314_v10 = vadd.f32 %v1313_v20, %v3990_v23 }
 0x15d   : > { %v1362_v11 = vpop.f32.mrf.mxu3  ;;  %v1217_v22 = vpop.f32.mrf.mxu0 }
 0x15e   : > { %v1363_v39 = vadd.f32 %v1362_v11, %v1314_v10  ;;  %v1218_v14 = vadd.f32 %v1217_v22, %v3986_v41 }
 0x15f   : > { %v1266_v13 = vpop.f32.mrf.mxu1 }
 0x160   : > { %v1401_v33 = vpack.c.bf16 %v1363_v39, %v1265_v9  ;;  %v1267_v34 = vadd.f32 %v1266_v13, %v1218_v14 }
 0x162   : > { %1433 = vst [vmem:[%s3288_s7 + $0x48] sm:$0xff] %v1401_v33  ;;  %v1315_v18 = vpop.f32.mrf.mxu2 }
 0x163   : > { %v1316_v15 = vadd.f32 %v1315_v18, %v3990_v23 }
 0x165   : > { %v1364_v16 = vpop.f32.mrf.mxu3  ;;  %v1220_v31 = vpop.f32.mrf.mxu0 }
 0x166   : > { %v1365_v35 = vadd.f32 %v1364_v16, %v1316_v15  ;;  %v1221_v26 = vadd.f32 %v1220_v31, %v3986_v41 }
 0x167   : > { %v1269_v37 = vpop.f32.mrf.mxu1 }
 0x168   : > { %v1403_v38 = vpack.c.bf16 %v1365_v35, %v1267_v34  ;;  %v1270_v57 = vadd.f32 %v1269_v37, %v1221_v26 }
 0x16a   : > { %1435 = vst [vmem:[%s3288_s7 + $0x58] sm:$0xff] %v1403_v38  ;;  %v1318_v56 = vpop.f32.mrf.mxu2 }
 0x16b   : > { %v1319_v43 = vadd.f32 %v1318_v56, %v3990_v23 }
 0x16d   : > { %v1367_v45 = vpop.f32.mrf.mxu3  ;;  %v1222_v17 = vpop.f32.mrf.mxu0 }
 0x16e   : > { %v1368_v40 = vadd.f32 %v1367_v45, %v1319_v43  ;;  %v1223_v59 = vadd.f32 %v1222_v17, %v3986_v41 }
 0x16f   : > { %v1271_v32 = vpop.f32.mrf.mxu1 }
 0x170   : > { %v1405_v19 = vpack.c.bf16 %v1368_v40, %v1270_v57  ;;  %v1272_v27 = vadd.f32 %v1271_v32, %v1223_v59 }
 0x172   : > { %1437 = vst [vmem:[%s3288_s7 + $0x68] sm:$0xff] %v1405_v19  ;;  %v1320_v24 = vpop.f32.mrf.mxu2 }
 0x173   : > { %v1321_v63 = vadd.f32 %v1320_v24, %v3990_v23 }
 0x175   : > { %v1369_v21 = vpop.f32.mrf.mxu3  ;;  %v1225_v49 = vpop.f32.mrf.mxu0 }
 0x176   : > { %v1370_v28 = vadd.f32 %v1369_v21, %v1321_v63  ;;  %v1226_v30 = vadd.f32 %v1225_v49, %v3986_v41 }
 0x177   : > { %v1274_v25 = vpop.f32.mrf.mxu1 }
 0x178   : > { %v1407_v29 = vpack.c.bf16 %v1370_v28, %v1272_v27  ;;  %v1275_v48 = vadd.f32 %v1274_v25, %v1226_v30 }
 0x17a   : > { %1439 = vst [vmem:[%s3288_s7 + $0x78] sm:$0xff] %v1407_v29  ;;  %v1323_v47 = vpop.f32.mrf.mxu2 }
 0x17b   : > { %v1324_v58 = vadd.f32 %v1323_v47, %v3990_v23 }
 0x17d   : > { %v1372_v50 = vpop.f32.mrf.mxu3  ;;  %v1227_v51 = vpop.f32.mrf.mxu0 }
 0x17e   : > { %v1373_v52 = vadd.f32 %v1372_v50, %v1324_v58  ;;  %v1228_v36 = vadd.f32 %v1227_v51, %v3986_v41 }
 0x17f   : > { %v1276_v53 = vpop.f32.mrf.mxu1 }
 0x180   : > { %v1409_v54 = vpack.c.bf16 %v1373_v52, %v1275_v48  ;;  %v1277_v61 = vadd.f32 %v1276_v53, %v1228_v36 }
 0x182   : > { %1441 = vst [vmem:[%s3288_s7 + $0x88] sm:$0xff] %v1409_v54  ;;  %v1325_v55 = vpop.f32.mrf.mxu2 }
 0x183   : > { %v1326_v42 = vadd.f32 %v1325_v55, %v3990_v23 }
 0x185   : > { %v1374_v60 = vpop.f32.mrf.mxu3  ;;  %v1230_v44 = vpop.f32.mrf.mxu0 }
 0x186   : > { %v1375_v62 = vadd.f32 %v1374_v60, %v1326_v42  ;;  %v1231_v1 = vadd.f32 %v1230_v44, %v3986_v41 }
 0x187   : > { %v1279_v46 = vpop.f32.mrf.mxu1 }
 0x188   : > { %v1411_v0 = vpack.c.bf16 %v1375_v62, %v1277_v61  ;;  %v1280_v3 = vadd.f32 %v1279_v46, %v1231_v1 }
 0x18a   : > { %1443 = vst [vmem:[%s3288_s7 + $0x98] sm:$0xff] %v1411_v0  ;;  %v1328_v2 = vpop.f32.mrf.mxu2 }
 0x18b   : > { %v1329_v4 = vadd.f32 %v1328_v2, %v3990_v23 }
 0x18d   : > { %v1377_v5 = vpop.f32.mrf.mxu3  ;;  %v1232_v6 = vpop.f32.mrf.mxu0 }
 0x18e   : > { %v1378_v7 = vadd.f32 %v1377_v5, %v1329_v4  ;;  %v1233_v20 = vadd.f32 %v1232_v6, %v3986_v41 }
 0x18f   : > { %v1281_v12 = vpop.f32.mrf.mxu1 }
 0x190   : > { %v1413_v8 = vpack.c.bf16 %v1378_v7, %v1280_v3  ;;  %v1282_v39 = vadd.f32 %v1281_v12, %v1233_v20 }
 0x192   : > { %1445 = vst [vmem:[%s3288_s7 + $0xa8] sm:$0xff] %v1413_v8  ;;  %v1330_v9 = vpop.f32.mrf.mxu2 }
 0x193   : > { %v1331_v10 = vadd.f32 %v1330_v9, %v3990_v23 }
 0x195   : > { %v1379_v11 = vpop.f32.mrf.mxu3  ;;  %v1235_v22 = vpop.f32.mrf.mxu0 }
 0x196   : > { %v1380_v13 = vadd.f32 %v1379_v11, %v1331_v10  ;;  %v1236_v18 = vadd.f32 %v1235_v22, %v3986_v41 }
 0x197   : > { %v1284_v33 = vpop.f32.mrf.mxu1 }
 0x198   : > { %v1415_v14 = vpack.c.bf16 %v1380_v13, %v1282_v39  ;;  %v1285_v16 = vadd.f32 %v1284_v33, %v1236_v18 }
 0x19a   : > { %1447 = vst [vmem:[%s3288_s7 + $0xb8] sm:$0xff] %v1415_v14  ;;  %v1333_v15 = vpop.f32.mrf.mxu2 }
 0x19b   : > { %v1334_v31 = vadd.f32 %v1333_v15, %v3990_v23 }
 0x19d   : > { %v1382_v34 = vpop.f32.mrf.mxu3  ;;  %v1237_v35 = vpop.f32.mrf.mxu0 }
 0x19e   : > { %v1383_v37 = vadd.f32 %v1382_v34, %v1334_v31  ;;  %v1238_v56 = vadd.f32 %v1237_v35, %v3986_v41 }
 0x19f   : > { %v1286_v26 = vpop.f32.mrf.mxu1 }
 0x1a0   : > { %v1417_v38 = vpack.c.bf16 %v1383_v37, %v1285_v16  ;;  %v1287_v40 = vadd.f32 %v1286_v26, %v1238_v56 }
 0x1a2   : > { %1449 = vst [vmem:[%s3288_s7 + $0xc8] sm:$0xff] %v1417_v38  ;;  %v1335_v57 = vpop.f32.mrf.mxu2 }
 0x1a3   : > { %v1336_v43 = vadd.f32 %v1335_v57, %v3990_v23 }
 0x1a5   : > { %v1384_v45 = vpop.f32.mrf.mxu3  ;;  %v1240_v17 = vpop.f32.mrf.mxu0 }
 0x1a6   : > { %v1385_v32 = vadd.f32 %v1384_v45, %v1336_v43  ;;  %v1241_v59 = vadd.f32 %v1240_v17, %v3986_v41 }
 0x1a7   : > { %v1289_v24 = vpop.f32.mrf.mxu1 }
 0x1a8   : > { %v1419_v19 = vpack.c.bf16 %v1385_v32, %v1287_v40  ;;  %v1290_v21 = vadd.f32 %v1289_v24, %v1241_v59 }
 0x1aa   : > { %1451 = vst [vmem:[%s3288_s7 + $0xd8] sm:$0xff] %v1419_v19  ;;  %v1338_v63 = vpop.f32.mrf.mxu2 }
 0x1ab   : > { %v1339_v49 = vadd.f32 %v1338_v63, %v3990_v23 }
 0x1ad   : > { %v1387_v27 = vpop.f32.mrf.mxu3  ;;  %v1242_v25 = vpop.f32.mrf.mxu0 }
 0x1ae   : > { %v1388_v28 = vadd.f32 %v1387_v27, %v1339_v49  ;;  %v1243_v30 = vadd.f32 %v1242_v25, %v3986_v41 }
 0x1af   : > { %v1291_v58 = vpop.f32.mrf.mxu1 }
 0x1b0   : > { %v1421_v29 = vpack.c.bf16 %v1388_v28, %v1290_v21  ;;  %v1292_v51 = vadd.f32 %v1291_v58, %v1243_v30 }
 0x1b2   : > { %1453 = vst [vmem:[%s3288_s7 + $0xe8] sm:$0xff] %v1421_v29  ;;  %v1340_v47 = vpop.f32.mrf.mxu2 }
 0x1b3   : > { %v1341_v48 = vadd.f32 %v1340_v47, %v3990_v23 }
 0x1b5   : > { %v1389_v50 = vpop.f32.mrf.mxu3 }
 0x1b6   : > { %v1390_v52 = vadd.f32 %v1389_v50, %v1341_v48 }
 0x1b8   : > { %v1423_v53 = vpack.c.bf16 %v1390_v52, %v1292_v51 }
 0x1ba   : > { %1455 = vst [vmem:[%s3288_s7 + $0xf8] sm:$0xff] %v1423_v53 }
 0x1bb PF: > { %p2750_p9 = scmp.lt.s32.totalorder %s3267_s16, 1 }
 0x1bd   : > { %1459 = sbr.rel (%p2750_p9) target bundleno = 872 (0x368), region = 44 }
 0x1c2   : > { %v2929_v54 = vld [vmem:[%s4671_s2 + $0xe0] sm:$0xf]  ;;  %v3186_v41 = vld [vmem:[%s4671_s2 + $0xec] sm:$0xf0]  ;;  %v3184_v42 = vld [vmem:[%s4671_s2 + $0xe4] sm:$0xf] }
 0x1c3   : > { %v3057_v23 = vld [vmem:[%s4671_s2 + $0x1e0] sm:$0xf]  ;;  %v2930_v36 = vor.u32 %v3186_v41, %v2929_v54  ;;  %v3218_v55 = vld [vmem:[%s4671_s2 + $0x1ec] sm:$0xf0]  ;;  %v2931_v60 = vld [vmem:[%s4671_s2 + $0xf0] sm:$0xf0] }
 0x1c4   : > { %v3058_v44 = vor.u32 %v3218_v55, %v3057_v23  ;;  %v2934_v61 = vor.u32 %v3184_v42, %v2931_v60  ;;  %v3216_v62 = vld [vmem:[%s4671_s2 + $0x1e4] sm:$0xf]  ;;  %v3059_v46 = vld [vmem:[%s4671_s2 + $0x1f0] sm:$0xf0]  ;;  %v2913_v0 = vld [vmem:[%s4671_s2 + $0xc0] sm:$0xf] }
 0x1c5   : > { %1950 = vmatpush.bf16.msra.mxu0 %v2930_v36  ;;  %v3062_v1 = vor.u32 %v3216_v62, %v3059_v46  ;;  %v3182_v2 = vld [vmem:[%s4671_s2 + $0xcc] sm:$0xf0]  ;;  %v3041_v3 = vld [vmem:[%s4671_s2 + $0x1c0] sm:$0xf]  ;;  %v3180_v7 = vld [vmem:[%s4671_s2 + $0xc4] sm:$0xf] }
 0x1c6   : > { %v3214_v4 = vld [vmem:[%s4671_s2 + $0x1cc] sm:$0xf0]  ;;  %1999 = vmatpush.bf16.msra.mxu1 %v3058_v44  ;;  %2048 = vmatpush.bf16.msra.mxu2 %v2934_v61  ;;  %v2914_v5 = vor.u32 %v3182_v2, %v2913_v0  ;;  %v2915_v12 = vld [vmem:[%s4671_s2 + $0xd0] sm:$0xf0]  ;;  %v3212_v8 = vld [vmem:[%s4671_s2 + $0x1c4] sm:$0xf] }
 0x1c7   : > { %v3042_v6 = vor.u32 %v3214_v4, %v3041_v3  ;;  %2097 = vmatpush.bf16.msra.mxu3 %v3062_v1  ;;  %v2918_v20 = vor.u32 %v3180_v7, %v2915_v12  ;;  %v3043_v9 = vld [vmem:[%s4671_s2 + $0x1d0] sm:$0xf0]  ;;  %v2897_v10 = vld [vmem:[%s4671_s2 + $0xa0] sm:$0xf]  ;;  %v3178_v11 = vld [vmem:[%s4671_s2 + $0xac] sm:$0xf0] }
 0x1c8   : > { %v3046_v22 = vor.u32 %v3212_v8, %v3043_v9  ;;  %v3025_v39 = vld [vmem:[%s4671_s2 + $0x1a0] sm:$0xf]  ;;  %v3210_v13 = vld [vmem:[%s4671_s2 + $0x1ac] sm:$0xf0]  ;;  %v3176_v33 = vld [vmem:[%s4671_s2 + $0xa4] sm:$0xf]  ;;  %v2898_v14 = vor.u32 %v3178_v11, %v2897_v10 }
 0x1c9   : > { %1951 = vmatpush.bf16.msra.mxu0 %v2914_v5  ;;  %v2899_v18 = vld [vmem:[%s4671_s2 + $0xb0] sm:$0xf0]  ;;  %v3208_v15 = vld [vmem:[%s4671_s2 + $0x1a4] sm:$0xf]  ;;  %v3026_v31 = vor.u32 %v3210_v13, %v3025_v39  ;;  %v2881_v35 = vld [vmem:[%s4671_s2 + $0x80] sm:$0xf] }
 0x1ca   : > { %v3027_v16 = vld [vmem:[%s4671_s2 + $0x1b0] sm:$0xf0]  ;;  %2000 = vmatpush.bf16.msra.mxu1 %v3042_v6  ;;  %2049 = vmatpush.bf16.msra.mxu2 %v2918_v20  ;;  %v2902_v34 = vor.u32 %v3176_v33, %v2899_v18  ;;  %v3174_v37 = vld [vmem:[%s4671_s2 + $0x8c] sm:$0xf0]  ;;  %v3009_v38 = vld [vmem:[%s4671_s2 + $0x180] sm:$0xf] }
 0x1cb   : > { %2098 = vmatpush.bf16.msra.mxu3 %v3046_v22  ;;  %v3030_v26 = vor.u32 %v3208_v15, %v3027_v16  ;;  %v3206_v56 = vld [vmem:[%s4671_s2 + $0x18c] sm:$0xf0]  ;;  %v3172_v57 = vld [vmem:[%s4671_s2 + $0x84] sm:$0xf]  ;;  %v2883_v43 = vld [vmem:[%s4671_s2 + $0x90] sm:$0xf0]  ;;  %v2882_v40 = vor.u32 %v3174_v37, %v2881_v35 }
 0x1cc   : > { %v3204_v45 = vld [vmem:[%s4671_s2 + $0x184] sm:$0xf]  ;;  %v3011_v17 = vld [vmem:[%s4671_s2 + $0x190] sm:$0xf0]  ;;  %v3010_v32 = vor.u32 %v3206_v56, %v3009_v38  ;;  %v2886_v19 = vor.u32 %v3172_v57, %v2883_v43  ;;  %v2865_v59 = vld [vmem:[%s4671_s2 + $0x60] sm:$0xf] }
 0x1cd   : > { %1952 = vmatpush.bf16.msra.mxu0 %v2898_v14  ;;  %v3170_v24 = vld [vmem:[%s4671_s2 + $0x6c] sm:$0xf0]  ;;  %v2993_v63 = vld [vmem:[%s4671_s2 + $0x160] sm:$0xf]  ;;  %v3014_v21 = vor.u32 %v3204_v45, %v3011_v17  ;;  %v3168_v27 = vld [vmem:[%s4671_s2 + $0x64] sm:$0xf] }
 0x1ce   : > { %2001 = vmatpush.bf16.msra.mxu1 %v3026_v31  ;;  %2050 = vmatpush.bf16.msra.mxu2 %v2902_v34  ;;  %v3202_v49 = vld [vmem:[%s4671_s2 + $0x16c] sm:$0xf0]  ;;  %v2867_v28 = vld [vmem:[%s4671_s2 + $0x70] sm:$0xf0]  ;;  %v3200_v25 = vld [vmem:[%s4671_s2 + $0x164] sm:$0xf]  ;;  %v2866_v30 = vor.u32 %v3170_v24, %v2865_v59 }
 0x1cf   : > { %2099 = vmatpush.bf16.msra.mxu3 %v3030_v26  ;;  %v2995_v29 = vld [vmem:[%s4671_s2 + $0x170] sm:$0xf0]  ;;  %v2994_v47 = vor.u32 %v3202_v49, %v2993_v63  ;;  %v2870_v48 = vor.u32 %v3168_v27, %v2867_v28  ;;  %v2849_v58 = vld [vmem:[%s4671_s2 + $0x40] sm:$0xf]  ;;  %v3166_v50 = vld [vmem:[%s4671_s2 + $0x4c] sm:$0xf0] }
 0x1d0   : > { %v2977_v51 = vld [vmem:[%s4671_s2 + $0x140] sm:$0xf]  ;;  %v2998_v52 = vor.u32 %v3200_v25, %v2995_v29  ;;  %v3198_v53 = vld [vmem:[%s4671_s2 + $0x14c] sm:$0xf0]  ;;  %v3164_v54 = vld [vmem:[%s4671_s2 + $0x44] sm:$0xf]  ;;  %v2850_v55 = vor.u32 %v3166_v50, %v2849_v58 }
 0x1d1   : > { %1953 = vmatpush.bf16.msra.mxu0 %v2882_v40  ;;  %v2851_v41 = vld [vmem:[%s4671_s2 + $0x50] sm:$0xf0]  ;;  %v3196_v23 = vld [vmem:[%s4671_s2 + $0x144] sm:$0xf]  ;;  %v2978_v42 = vor.u32 %v3198_v53, %v2977_v51  ;;  %v2833_v44 = vld [vmem:[%s4671_s2 + $0x20] sm:$0xf] }
 0x1d2   : > { %2002 = vmatpush.bf16.msra.mxu1 %v3010_v32  ;;  %2051 = vmatpush.bf16.msra.mxu2 %v2886_v19  ;;  %v2979_v36 = vld [vmem:[%s4671_s2 + $0x150] sm:$0xf0]  ;;  %v2854_v60 = vor.u32 %v3164_v54, %v2851_v41  ;;  %v3162_v61 = vld [vmem:[%s4671_s2 + $0x2c] sm:$0xf0]  ;;  %v2961_v62 = vld [vmem:[%s4671_s2 + $0x120] sm:$0xf] }
 0x1d3   : > { %2100 = vmatpush.bf16.msra.mxu3 %v3014_v21  ;;  %v2982_v46 = vor.u32 %v3196_v23, %v2979_v36  ;;  %v3194_v0 = vld [vmem:[%s4671_s2 + $0x12c] sm:$0xf0]  ;;  %v3160_v1 = vld [vmem:[%s4671_s2 + $0x24] sm:$0xf]  ;;  %v2835_v2 = vld [vmem:[%s4671_s2 + $0x30] sm:$0xf0]  ;;  %v2834_v5 = vor.u32 %v3162_v61, %v2833_v44 }
 0x1d4   : > { %v3192_v3 = vld [vmem:[%s4671_s2 + $0x124] sm:$0xf]  ;;  %v2963_v4 = vld [vmem:[%s4671_s2 + $0x130] sm:$0xf0]  ;;  %v2817_v6 = vld [vmem:[%s4671_s2] sm:$0xf]  ;;  %v2962_v12 = vor.u32 %v3194_v0, %v2961_v62  ;;  %v2838_v8 = vor.u32 %v3160_v1, %v2835_v2 }
 0x1d5   : > { %1954 = vmatpush.bf16.msra.mxu0 %v2866_v30  ;;  %v3158_v7 = vld [vmem:[%s4671_s2 + $0xc] sm:$0xf0]  ;;  %v2945_v20 = vld [vmem:[%s4671_s2 + $0x100] sm:$0xf]  ;;  %v3156_v10 = vld [vmem:[%s4671_s2 + $0x4] sm:$0xf]  ;;  %v2966_v11 = vor.u32 %v3192_v3, %v2963_v4 }
 0x1d6   : > { %2003 = vmatpush.bf16.msra.mxu1 %v2994_v47  ;;  %2052 = vmatpush.bf16.msra.mxu2 %v2870_v48  ;;  %v3190_v9 = vld [vmem:[%s4671_s2 + $0x10c] sm:$0xf0]  ;;  %v2819_v22 = vld [vmem:[%s4671_s2 + $0x10] sm:$0xf0]  ;;  %v3188_v39 = vld [vmem:[%s4671_s2 + $0x104] sm:$0xf]  ;;  %v2818_v15 = vor.u32 %v3158_v7, %v2817_v6 }
 0x1d7   : > { %2101 = vmatpush.bf16.msra.mxu3 %v2998_v52  ;;  %v2947_v13 = vld [vmem:[%s4671_s2 + $0x110] sm:$0xf0]  ;;  %v2753_v33 = vld [vmem:[%s3283_s29] sm:$0xf]  ;;  %v3185_v14 = vld [vmem:[%s4671_s2 + $0xec] sm:$0xf]  ;;  %v2946_v35 = vor.u32 %v3190_v9, %v2945_v20  ;;  %v2822_v37 = vor.u32 %v3156_v10, %v2819_v22 }
 0x1d8   : > { %v2939_v18 = vld [vmem:[%s4671_s2 + $0xf8] sm:$0xf0]  ;;  %v3141_v16 = vld [vmem:[%s3283_s29 + $0x4] sm:$0xf0]  ;;  %v3217_v31 = vld [vmem:[%s4671_s2 + $0x1ec] sm:$0xf]  ;;  %v2950_v56 = vor.u32 %v3188_v39, %v2947_v13 }
 0x1d9   : > { %1955 = vmatpush.bf16.msra.mxu0 %v2850_v55  ;;  %v3067_v34 = vld [vmem:[%s4671_s2 + $0x1f8] sm:$0xf0]  ;;  %v3140_v38 = vld [vmem:[%s3283_s29 + $0x4] sm:$0xf]  ;;  %v2755_v26 = vld [vmem:[%s3283_s29 + $0x8] sm:$0xf0]  ;;  %v2942_v57 = vor.u32 %v3185_v14, %v2939_v18  ;;  %v4258_v40 = vor.u32 %v3141_v16, %v2753_v33 }
 0x1da   : > { %2004 = vmatpush.bf16.msra.mxu1 %v2978_v42  ;;  %2053 = vmatpush.bf16.msra.mxu2 %v2854_v60  ;;  %v2937_v43 = vld [vmem:[%s4671_s2 + $0xe8] sm:$0xf]  ;;  %v3187_v45 = vld [vmem:[%s4671_s2 + $0xf4] sm:$0xf0]  ;;  %v3070_v32 = vor.u32 %v3217_v31, %v3067_v34  ;;  %v3181_v59 = vld [vmem:[%s4671_s2 + $0xcc] sm:$0xf]  ;;  %v4269_v63 = vor.u32 %v3140_v38, %v2755_v26 }
 0x1db   : > { %2102 = vmatpush.bf16.msra.mxu3 %v2982_v46  ;;  %v3065_v17 = vld [vmem:[%s4671_s2 + $0x1e8] sm:$0xf]  ;;  %v3219_v19 = vld [vmem:[%s4671_s2 + $0x1f4] sm:$0xf0]  ;;  %v2923_v24 = vld [vmem:[%s4671_s2 + $0xd8] sm:$0xf0]  ;;  %v2938_v27 = vor.u32 %v3187_v45, %v2937_v43 }
 0x1dc   : > { %v3213_v21 = vld [vmem:[%s4671_s2 + $0x1cc] sm:$0xf]  ;;  %v3051_v49 = vld [vmem:[%s4671_s2 + $0x1d8] sm:$0xf0]  ;;  %v3066_v28 = vor.u32 %v3219_v19, %v3065_v17  ;;  %v2926_v25 = vor.u32 %v3181_v59, %v2923_v24  ;;  %v2921_v29 = vld [vmem:[%s4671_s2 + $0xc8] sm:$0xf] }
 0x1dd   : > { %1956 = vmatpush.bf16.msra.mxu0 %v2834_v5  ;;  %v3183_v30 = vld [vmem:[%s4671_s2 + $0xd4] sm:$0xf0]  ;;  %v3054_v47 = vor.u32 %v3213_v21, %v3051_v49  ;;  %v3049_v48 = vld [vmem:[%s4671_s2 + $0x1c8] sm:$0xf]  ;;  %v3177_v51 = vld [vmem:[%s4671_s2 + $0xac] sm:$0xf] }
 0x1de   : > { %2005 = vmatpush.bf16.msra.mxu1 %v2962_v12  ;;  %2054 = vmatpush.bf16.msra.mxu2 %v2838_v8  ;;  %v3215_v58 = vld [vmem:[%s4671_s2 + $0x1d4] sm:$0xf0]  ;;  %v2922_v50 = vor.u32 %v3183_v30, %v2921_v29  ;;  %v2907_v52 = vld [vmem:[%s4671_s2 + $0xb8] sm:$0xf0]  ;;  %v3209_v53 = vld [vmem:[%s4671_s2 + $0x1ac] sm:$0xf] }
 0x1df   : > { %2103 = vmatpush.bf16.msra.mxu3 %v2966_v11  ;;  %v3050_v54 = vor.u32 %v3215_v58, %v3049_v48  ;;  %v2910_v41 = vor.u32 %v3177_v51, %v2907_v52  ;;  %v3035_v23 = vld [vmem:[%s4671_s2 + $0x1b8] sm:$0xf0]  ;;  %v2905_v36 = vld [vmem:[%s4671_s2 + $0xa8] sm:$0xf]  ;;  %v3179_v55 = vld [vmem:[%s4671_s2 + $0xb4] sm:$0xf0] }
 0x1e0   : > { %v3038_v42 = vor.u32 %v3209_v53, %v3035_v23  ;;  %v3033_v60 = vld [vmem:[%s4671_s2 + $0x1a8] sm:$0xf]  ;;  %v3211_v44 = vld [vmem:[%s4671_s2 + $0x1b4] sm:$0xf0]  ;;  %v2906_v61 = vor.u32 %v3179_v55, %v2905_v36  ;;  %v2761_v46 = vld [vmem:[%s3283_s29 + $0x10] sm:$0xf] }
 0x1e1   : > { %1957 = vmatpush.bf16.msra.mxu0 %v2818_v15  ;;  %v3034_v62 = vor.u32 %v3211_v44, %v3033_v60  ;;  %v3143_v0 = vld [vmem:[%s3283_s29 + $0x14] sm:$0xf0]  ;;  %v3142_v1 = vld [vmem:[%s3283_s29 + $0x14] sm:$0xf]  ;;  %v2763_v2 = vld [vmem:[%s3283_s29 + $0x18] sm:$0xf0] }
 0x1e2   : > { %2006 = vmatpush.bf16.msra.mxu1 %v2946_v35  ;;  %2055 = vmatpush.bf16.msra.mxu2 %v2822_v37  ;;  %v4321_v3 = vor.u32 %v3143_v0, %v2761_v46  ;;  %v4323_v4 = vor.u32 %v3142_v1, %v2763_v2  ;;  %v3173_v5 = vld [vmem:[%s4671_s2 + $0x8c] sm:$0xf]  ;;  %v2891_v6 = vld [vmem:[%s4671_s2 + $0x98] sm:$0xf0]  ;;  %v2889_v20 = vld [vmem:[%s4671_s2 + $0x88] sm:$0xf] }
 0x1e3   : > { %2104 = vmatpush.bf16.msra.mxu3 %v2950_v56  ;;  %v3205_v7 = vld [vmem:[%s4671_s2 + $0x18c] sm:$0xf]  ;;  %v2894_v12 = vor.u32 %v3173_v5, %v2891_v6  ;;  %v3019_v8 = vld [vmem:[%s4671_s2 + $0x198] sm:$0xf0]  ;;  %v3175_v9 = vld [vmem:[%s4671_s2 + $0x94] sm:$0xf0] }
 0x1e4   : > { %1958 = vmatmul.bf16.vlgmr.msra.gmra.mxu0 %v4258_v40  ;;  %v3022_v10 = vor.u32 %v3205_v7, %v3019_v8  ;;  %v2890_v11 = vor.u32 %v3175_v9, %v2889_v20  ;;  %v3017_v22 = vld [vmem:[%s4671_s2 + $0x188] sm:$0xf]  ;;  %v3207_v39 = vld [vmem:[%s4671_s2 + $0x194] sm:$0xf0]  ;;  %v2769_v33 = vld [vmem:[%s3283_s29 + $0x20] sm:$0xf] }
 0x1e5   : > { %2007 = vmatmul.bf16.vlgmr.msra.gmra.mxu1 %v4269_v63  ;;  %2056 = vmatmul.bf16.vlgmr.msra.gmra.mxu2 %v4258_v40  ;;  %v3018_v13 = vor.u32 %v3207_v39, %v3017_v22  ;;  %v3145_v14 = vld [vmem:[%s3283_s29 + $0x24] sm:$0xf0]  ;;  %v3144_v18 = vld [vmem:[%s3283_s29 + $0x24] sm:$0xf]  ;;  %v2771_v15 = vld [vmem:[%s3283_s29 + $0x28] sm:$0xf0] }
 0x1e6   : > { %2244 = vmatpush.bf16.msrb.mxu2 %v2942_v57  ;;  %2105 = vmatmul.bf16.vlgmr.msra.gmra.mxu3 %v4269_v63  ;;  %v4357_v16 = vor.u32 %v3145_v14, %v2769_v33  ;;  %v4359_v31 = vor.u32 %v3144_v18, %v2771_v15  ;;  %v3169_v34 = vld [vmem:[%s4671_s2 + $0x6c] sm:$0xf]  ;;  %v2875_v35 = vld [vmem:[%s4671_s2 + $0x78] sm:$0xf0]  ;;  %v2873_v56 = vld [vmem:[%s4671_s2 + $0x68] sm:$0xf] }
 0x1e7   : > { %2293 = vmatpush.bf16.msrb.mxu3 %v3070_v32  ;;  %2146 = vmatpush.bf16.msrb.mxu0 %v2938_v27  ;;  %v3201_v37 = vld [vmem:[%s4671_s2 + $0x16c] sm:$0xf]  ;;  %v2878_v38 = vor.u32 %v3169_v34, %v2875_v35  ;;  %v3003_v26 = vld [vmem:[%s4671_s2 + $0x178] sm:$0xf0]  ;;  %v3171_v57 = vld [vmem:[%s4671_s2 + $0x74] sm:$0xf0] }
 0x1e8   : > { %2195 = vmatpush.bf16.msrb.mxu1 %v3066_v28  ;;  %v3006_v43 = vor.u32 %v3201_v37, %v3003_v26  ;;  %v2874_v45 = vor.u32 %v3171_v57, %v2873_v56  ;;  %v3001_v17 = vld [vmem:[%s4671_s2 + $0x168] sm:$0xf]  ;;  %v3203_v32 = vld [vmem:[%s4671_s2 + $0x174] sm:$0xf0]  ;;  %v2777_v59 = vld [vmem:[%s3283_s29 + $0x30] sm:$0xf] }
 0x1e9   : > { %v3002_v19 = vor.u32 %v3203_v32, %v3001_v17  ;;  %v3147_v24 = vld [vmem:[%s3283_s29 + $0x34] sm:$0xf0]  ;;  %v3146_v21 = vld [vmem:[%s3283_s29 + $0x34] sm:$0xf]  ;;  %v2779_v49 = vld [vmem:[%s3283_s29 + $0x38] sm:$0xf0] }
 0x1ea   : > { %2245 = vmatpush.bf16.msrb.mxu2 %v2926_v25  ;;  %v4393_v27 = vor.u32 %v3147_v24, %v2777_v59  ;;  %v4395_v28 = vor.u32 %v3146_v21, %v2779_v49  ;;  %v3165_v25 = vld [vmem:[%s4671_s2 + $0x4c] sm:$0xf]  ;;  %v2859_v29 = vld [vmem:[%s4671_s2 + $0x58] sm:$0xf0]  ;;  %v2857_v58 = vld [vmem:[%s4671_s2 + $0x48] sm:$0xf] }
 0x1eb   : > { %2294 = vmatpush.bf16.msrb.mxu3 %v3054_v47  ;;  %2147 = vmatpush.bf16.msrb.mxu0 %v2922_v50  ;;  %v3197_v30 = vld [vmem:[%s4671_s2 + $0x14c] sm:$0xf]  ;;  %v2862_v47 = vor.u32 %v3165_v25, %v2859_v29  ;;  %v2987_v48 = vld [vmem:[%s4671_s2 + $0x158] sm:$0xf0]  ;;  %v3167_v50 = vld [vmem:[%s4671_s2 + $0x54] sm:$0xf0] }
 0x1ec   : > { %2196 = vmatpush.bf16.msrb.mxu1 %v3050_v54  ;;  %v2990_v51 = vor.u32 %v3197_v30, %v2987_v48  ;;  %v2858_v52 = vor.u32 %v3167_v50, %v2857_v58  ;;  %v2985_v53 = vld [vmem:[%s4671_s2 + $0x148] sm:$0xf]  ;;  %v3199_v54 = vld [vmem:[%s4671_s2 + $0x154] sm:$0xf0]  ;;  %v2785_v23 = vld [vmem:[%s3283_s29 + $0x40] sm:$0xf] }
 0x1ed   : > { %v3149_v36 = vld [vmem:[%s3283_s29 + $0x44] sm:$0xf0]  ;;  %v3148_v55 = vld [vmem:[%s3283_s29 + $0x44] sm:$0xf]  ;;  %v3193_v46 = vld [vmem:[%s4671_s2 + $0x12c] sm:$0xf] }
 0x1ee   : > { %2246 = vmatpush.bf16.msrb.mxu2 %v2910_v41  ;;  %v2986_v41 = vor.u32 %v3199_v54, %v2985_v53  ;;  %v4429_v60 = vor.u32 %v3149_v36, %v2785_v23  ;;  %v2971_v1 = vld [vmem:[%s4671_s2 + $0x138] sm:$0xf0]  ;;  %v2841_v2 = vld [vmem:[%s4671_s2 + $0x28] sm:$0xf]  ;;  %v3163_v5 = vld [vmem:[%s4671_s2 + $0x34] sm:$0xf0] }
 0x1ef   : > { %2295 = vmatpush.bf16.msrb.mxu3 %v3038_v42  ;;  %2148 = vmatpush.bf16.msrb.mxu0 %v2906_v61  ;;  %v2787_v42 = vld [vmem:[%s3283_s29 + $0x48] sm:$0xf0]  ;;  %v2974_v6 = vor.u32 %v3193_v46, %v2971_v1  ;;  %v2842_v7 = vor.u32 %v3163_v5, %v2841_v2  ;;  %v3195_v8 = vld [vmem:[%s4671_s2 + $0x134] sm:$0xf0]  ;;  %v2793_v9 = vld [vmem:[%s3283_s29 + $0x50] sm:$0xf] }
 0x1f0   : > { %2197 = vmatpush.bf16.msrb.mxu1 %v3034_v62  ;;  %v4431_v44 = vor.u32 %v3148_v55, %v2787_v42  ;;  %v3161_v61 = vld [vmem:[%s4671_s2 + $0x2c] sm:$0xf]  ;;  %v2843_v62 = vld [vmem:[%s4671_s2 + $0x38] sm:$0xf0]  ;;  %v2825_v35 = vld [vmem:[%s4671_s2 + $0x8] sm:$0xf] }
 0x1f1   : > { %v2846_v0 = vor.u32 %v3161_v61, %v2843_v62  ;;  %v2795_v22 = vld [vmem:[%s3283_s29 + $0x58] sm:$0xf0]  ;;  %v3157_v33 = vld [vmem:[%s4671_s2 + $0xc] sm:$0xf]  ;;  %v3159_v37 = vld [vmem:[%s4671_s2 + $0x14] sm:$0xf0] }
 0x1f2   : > { %2247 = vmatpush.bf16.msrb.mxu2 %v2894_v12  ;;  %v2969_v12 = vld [vmem:[%s4671_s2 + $0x128] sm:$0xf]  ;;  %v2827_v14 = vld [vmem:[%s4671_s2 + $0x18] sm:$0xf0]  ;;  %v3189_v18 = vld [vmem:[%s4671_s2 + $0x10c] sm:$0xf]  ;;  %v2826_v26 = vor.u32 %v3159_v37, %v2825_v35 }
 0x1f3   : > { %2296 = vmatpush.bf16.msrb.mxu3 %v3022_v10  ;;  %2149 = vmatpush.bf16.msrb.mxu0 %v2890_v11  ;;  %v2970_v20 = vor.u32 %v3195_v8, %v2969_v12  ;;  %v3151_v10 = vld [vmem:[%s3283_s29 + $0x54] sm:$0xf0]  ;;  %v3150_v11 = vld [vmem:[%s3283_s29 + $0x54] sm:$0xf]  ;;  %v2830_v15 = vor.u32 %v3157_v33, %v2827_v14  ;;  %v2955_v34 = vld [vmem:[%s4671_s2 + $0x118] sm:$0xf0] }
 0x1f4   : > { %1963 = vmatmul.bf16.gmra.mxu0 %v4321_v3  ;;  %2198 = vmatpush.bf16.msrb.mxu1 %v3018_v13  ;;  %v4465_v39 = vor.u32 %v3151_v10, %v2793_v9  ;;  %v4467_v13 = vor.u32 %v3150_v11, %v2795_v22  ;;  %v2953_v56 = vld [vmem:[%s4671_s2 + $0x108] sm:$0xf]  ;;  %v3191_v57 = vld [vmem:[%s4671_s2 + $0x114] sm:$0xf0]  ;;  %v3152_v32 = vld [vmem:[%s3283_s29 + $0x64] sm:$0xf] }
 0x1f5   : > { %2012 = vmatmul.bf16.gmra.mxu1 %v4323_v4  ;;  %2061 = vmatmul.bf16.gmra.mxu2 %v4321_v3  ;;  %v3153_v17 = vld [vmem:[%s3283_s29 + $0x64] sm:$0xf0]  ;;  %v2809_v21 = vld [vmem:[%s3283_s29 + $0x70] sm:$0xf]  ;;  %v3155_v49 = vld [vmem:[%s3283_s29 + $0x74] sm:$0xf0] }
 0x1f6   : > { %2110 = vmatmul.bf16.gmra.mxu3 %v4323_v4  ;;  %2248 = vmatpush.bf16.msrb.mxu2 %v2878_v38  ;;  %v2958_v38 = vor.u32 %v3189_v18, %v2955_v34  ;;  %v3154_v25 = vld [vmem:[%s3283_s29 + $0x74] sm:$0xf]  ;;  %v2811_v29 = vld [vmem:[%s3283_s29 + $0x78] sm:$0xf0]  ;;  %v4513_v30 = vor.u32 %v3155_v49, %v2809_v21  ;;  %v4524_v48 = vld [vmem:[%s4672_s3] sm:$0xf] }
 0x1f7   : > { %2297 = vmatpush.bf16.msrb.mxu3 %v3006_v43  ;;  %2150 = vmatpush.bf16.msrb.mxu0 %v2874_v45  ;;  %v2954_v43 = vor.u32 %v3191_v57, %v2953_v56  ;;  %v2801_v45 = vld [vmem:[%s3283_s29 + $0x60] sm:$0xf]  ;;  %v4527_v58 = vperm.slane %v4524_v48, 0  ;;  %v4534_v53 = vperm.slane %v4524_v48, 1 }
 0x1f8   : > { %2199 = vmatpush.bf16.msrb.mxu1 %v3002_v19  ;;  %v2803_v19 = vld [vmem:[%s3283_s29 + $0x68] sm:$0xf0]  ;;  %v4501_v59 = vor.u32 %v3153_v17, %v2801_v45 }
 0x1f9   : > { %v4503_v24 = vor.u32 %v3152_v32, %v2803_v19 }
 0x1fa   : > { %2249 = vmatpush.bf16.msrb.mxu2 %v2862_v47  ;;  %v4515_v47 = vor.u32 %v3154_v25, %v2811_v29 }
 0x1fb   : > { %2298 = vmatpush.bf16.msrb.mxu3 %v2990_v51  ;;  %2151 = vmatpush.bf16.msrb.mxu0 %v2858_v52 }
 0x1fc   : > { %2200 = vmatpush.bf16.msrb.mxu1 %v2986_v41 }
 0x1fe   : > { %2250 = vmatpush.bf16.msrb.mxu2 %v2846_v0 }
 0x1ff   : > { %2299 = vmatpush.bf16.msrb.mxu3 %v2974_v6  ;;  %2152 = vmatpush.bf16.msrb.mxu0 %v2842_v7 }
 0x200   : > { %2201 = vmatpush.bf16.msrb.mxu1 %v2970_v20 }
 0x202   : > { %2251 = vmatpush.bf16.msrb.mxu2 %v2830_v15 }
 0x203   : > { %2300 = vmatpush.bf16.msrb.mxu3 %v2958_v38  ;;  %2153 = vmatpush.bf16.msrb.mxu0 %v2826_v26 }
 0x204   : > { %1968 = vmatmul.bf16.gmra.mxu0 %v4357_v16  ;;  %2202 = vmatpush.bf16.msrb.mxu1 %v2954_v43 }
 0x205   : > { %2017 = vmatmul.bf16.gmra.mxu1 %v4359_v31  ;;  %2066 = vmatmul.bf16.gmra.mxu2 %v4357_v16 }
 0x206   : > { %2115 = vmatmul.bf16.gmra.mxu3 %v4359_v31 }
 0x214   : > { %1973 = vmatmul.bf16.gmra.mxu0 %v4393_v27 }
 0x215   : > { %2022 = vmatmul.bf16.gmra.mxu1 %v4395_v28  ;;  %2071 = vmatmul.bf16.gmra.mxu2 %v4393_v27 }
 0x216   : > { %2120 = vmatmul.bf16.gmra.mxu3 %v4395_v28 }
 0x224   : > { %1978 = vmatmul.bf16.gmra.mxu0 %v4429_v60 }
 0x225   : > { %2027 = vmatmul.bf16.gmra.mxu1 %v4431_v44  ;;  %2076 = vmatmul.bf16.gmra.mxu2 %v4429_v60 }
 0x226   : > { %2125 = vmatmul.bf16.gmra.mxu3 %v4431_v44 }
 0x234   : > { %1983 = vmatmul.bf16.gmra.mxu0 %v4465_v39 }
 0x235   : > { %2032 = vmatmul.bf16.gmra.mxu1 %v4467_v13  ;;  %2081 = vmatmul.bf16.gmra.mxu2 %v4465_v39 }
 0x236   : > { %2130 = vmatmul.bf16.gmra.mxu3 %v4467_v13 }
 0x244   : > { %1988 = vmatmul.bf16.gmra.mxu0 %v4501_v59 }
 0x245   : > { %2037 = vmatmul.bf16.gmra.mxu1 %v4503_v24  ;;  %2086 = vmatmul.bf16.gmra.mxu2 %v4501_v59 }
 0x246   : > { %2135 = vmatmul.bf16.gmra.mxu3 %v4503_v24 }
 0x254   : > { %1993 = vmatmul.bf16.gmra.mxu0 %v4513_v30 }
 0x255   : > { %2042 = vmatmul.bf16.gmra.mxu1 %v4515_v47  ;;  %2091 = vmatmul.bf16.gmra.mxu2 %v4513_v30 }
 0x256   : > { %2140 = vmatmul.bf16.gmra.mxu3 %v4515_v47 }
 0x261   : > { %v1959_v50 = vpop.f32.mrf.mxu0 }
 0x262   : > { %v2008_v51 = vpop.f32.mrf.mxu1  ;;  %v1960_v52 = vadd.f32 %v1959_v50, %v4527_v58 }
 0x264   : > { %2154 = vmatmul.bf16.vlgmr.msrb.gmra.mxu0 %v4258_v40  ;;  %v2009_v41 = vadd.f32 %v2008_v51, %v1960_v52 }
 0x265   : > { %2203 = vmatmul.bf16.vlgmr.msrb.gmra.mxu1 %v4269_v63  ;;  %2252 = vmatmul.bf16.vlgmr.msrb.gmra.mxu2 %v4258_v40 }
 0x266   : > { %2301 = vmatmul.bf16.vlgmr.msrb.gmra.mxu3 %v4269_v63 }
 0x268   : > { %v2057_v54 = vpop.f32.mrf.mxu2 }
 0x269   : > { %v2058_v23 = vadd.f32 %v2057_v54, %v4534_v53  ;;  %v2106_v36 = vpop.f32.mrf.mxu3  ;;  %v1961_v55 = vpop.f32.mrf.mxu0 }
 0x26a   : > { %v2010_v42 = vpop.f32.mrf.mxu1  ;;  %v1962_v46 = vadd.f32 %v1961_v55, %v4527_v58 }
 0x26b   : > { %v2107_v61 = vadd.f32 %v2106_v36, %v2058_v23 }
 0x26c   : > { %v2011_v63 = vadd.f32 %v2010_v42, %v1962_v46 }
 0x26d   : > { %v2342_v62 = vpack.c.bf16 %v2107_v61, %v2009_v41 }
 0x26f   : > { %2374 = vst [vmem:[%s3288_s7] sm:$0xff] %v2342_v62 }
 0x270   : > { %v2059_v0 = vpop.f32.mrf.mxu2 }
 0x271   : > { %v2060_v40 = vadd.f32 %v2059_v0, %v4534_v53  ;;  %v2108_v1 = vpop.f32.mrf.mxu3  ;;  %v1964_v2 = vpop.f32.mrf.mxu0 }
 0x272   : > { %v2013_v5 = vpop.f32.mrf.mxu1  ;;  %v1965_v12 = vadd.f32 %v1964_v2, %v4527_v58 }
 0x273   : > { %v2109_v6 = vadd.f32 %v2108_v1, %v2060_v40 }
 0x274   : > { %2159 = vmatmul.bf16.gmra.mxu0 %v4321_v3  ;;  %v2014_v20 = vadd.f32 %v2013_v5, %v1965_v12 }
 0x275   : > { %v2344_v7 = vpack.c.bf16 %v2109_v6, %v2011_v63  ;;  %2208 = vmatmul.bf16.gmra.mxu1 %v4323_v4  ;;  %2257 = vmatmul.bf16.gmra.mxu2 %v4321_v3 }
 0x276   : > { %2306 = vmatmul.bf16.gmra.mxu3 %v4323_v4 }
 0x277   : > { %2376 = vst [vmem:[%s3288_s7 + $0x10] sm:$0xff] %v2344_v7 }
 0x278   : > { %v2062_v8 = vpop.f32.mrf.mxu2 }
 0x279   : > { %v2063_v9 = vadd.f32 %v2062_v8, %v4534_v53  ;;  %v2111_v10 = vpop.f32.mrf.mxu3  ;;  %v1966_v11 = vpop.f32.mrf.mxu0 }
 0x27a   : > { %v2015_v22 = vpop.f32.mrf.mxu1  ;;  %v1967_v18 = vadd.f32 %v1966_v11, %v4527_v58 }
 0x27b   : > { %v2112_v33 = vadd.f32 %v2111_v10, %v2063_v9 }
 0x27c   : > { %v2016_v37 = vadd.f32 %v2015_v22, %v1967_v18 }
 0x27d   : > { %v2346_v14 = vpack.c.bf16 %v2112_v33, %v2014_v20 }
 0x27f   : > { %2378 = vst [vmem:[%s3288_s7 + $0x20] sm:$0xff] %v2346_v14 }
 0x280   : > { %v2064_v15 = vpop.f32.mrf.mxu2 }
 0x281   : > { %v2065_v34 = vadd.f32 %v2064_v15, %v4534_v53  ;;  %v2113_v3 = vpop.f32.mrf.mxu3  ;;  %v1969_v35 = vpop.f32.mrf.mxu0 }
 0x282   : > { %v2018_v4 = vpop.f32.mrf.mxu1  ;;  %v1970_v56 = vadd.f32 %v1969_v35, %v4527_v58 }
 0x283   : > { %v2114_v38 = vadd.f32 %v2113_v3, %v2065_v34 }
 0x284   : > { %2164 = vmatmul.bf16.gmra.mxu0 %v4357_v16  ;;  %v2019_v43 = vadd.f32 %v2018_v4, %v1970_v56 }
 0x285   : > { %v2348_v26 = vpack.c.bf16 %v2114_v38, %v2016_v37  ;;  %2213 = vmatmul.bf16.gmra.mxu1 %v4359_v31  ;;  %2262 = vmatmul.bf16.gmra.mxu2 %v4357_v16 }
 0x286   : > { %2311 = vmatmul.bf16.gmra.mxu3 %v4359_v31 }
 0x287   : > { %2380 = vst [vmem:[%s3288_s7 + $0x30] sm:$0xff] %v2348_v26 }
 0x288   : > { %v2067_v57 = vpop.f32.mrf.mxu2 }
 0x289   : > { %v2068_v45 = vadd.f32 %v2067_v57, %v4534_v53  ;;  %v2116_v17 = vpop.f32.mrf.mxu3  ;;  %v1971_v32 = vpop.f32.mrf.mxu0 }
 0x28a   : > { %v2020_v19 = vpop.f32.mrf.mxu1  ;;  %v1972_v25 = vadd.f32 %v1971_v32, %v4527_v58 }
 0x28b   : > { %v2117_v21 = vadd.f32 %v2116_v17, %v2068_v45 }
 0x28c   : > { %v2021_v52 = vadd.f32 %v2020_v19, %v1972_v25 }
 0x28d   : > { %v2350_v49 = vpack.c.bf16 %v2117_v21, %v2019_v43 }
 0x28f   : > { %2382 = vst [vmem:[%s3288_s7 + $0x40] sm:$0xff] %v2350_v49 }
 0x290   : > { %v2069_v29 = vpop.f32.mrf.mxu2 }
 0x291   : > { %v2070_v50 = vadd.f32 %v2069_v29, %v4534_v53  ;;  %v2118_v16 = vpop.f32.mrf.mxu3  ;;  %v1974_v51 = vpop.f32.mrf.mxu0 }
 0x292   : > { %v2023_v31 = vpop.f32.mrf.mxu1  ;;  %v1975_v23 = vadd.f32 %v1974_v51, %v4527_v58 }
 0x293   : > { %v2119_v54 = vadd.f32 %v2118_v16, %v2070_v50 }
 0x294   : > { %2169 = vmatmul.bf16.gmra.mxu0 %v4393_v27  ;;  %v2024_v55 = vadd.f32 %v2023_v31, %v1975_v23 }
 0x295   : > { %v2352_v41 = vpack.c.bf16 %v2119_v54, %v2021_v52  ;;  %2218 = vmatmul.bf16.gmra.mxu1 %v4395_v28  ;;  %2267 = vmatmul.bf16.gmra.mxu2 %v4393_v27 }
 0x296   : > { %2316 = vmatmul.bf16.gmra.mxu3 %v4395_v28 }
 0x297   : > { %2384 = vst [vmem:[%s3288_s7 + $0x50] sm:$0xff] %v2352_v41 }
 0x298   : > { %v2072_v36 = vpop.f32.mrf.mxu2 }
 0x299   : > { %v2073_v42 = vadd.f32 %v2072_v36, %v4534_v53  ;;  %v2121_v61 = vpop.f32.mrf.mxu3  ;;  %v1976_v62 = vpop.f32.mrf.mxu0 }
 0x29a   : > { %v2025_v46 = vpop.f32.mrf.mxu1  ;;  %v1977_v1 = vadd.f32 %v1976_v62, %v4527_v58 }
 0x29b   : > { %v2122_v0 = vadd.f32 %v2121_v61, %v2073_v42 }
 0x29c   : > { %v2026_v6 = vadd.f32 %v2025_v46, %v1977_v1 }
 0x29d   : > { %v2354_v40 = vpack.c.bf16 %v2122_v0, %v2024_v55 }
 0x29f   : > { %2386 = vst [vmem:[%s3288_s7 + $0x60] sm:$0xff] %v2354_v40 }
 0x2a0   : > { %v2074_v2 = vpop.f32.mrf.mxu2 }
 0x2a1   : > { %v2075_v5 = vadd.f32 %v2074_v2, %v4534_v53  ;;  %v2123_v27 = vpop.f32.mrf.mxu3  ;;  %v1979_v63 = vpop.f32.mrf.mxu0 }
 0x2a2   : > { %v2028_v28 = vpop.f32.mrf.mxu1  ;;  %v1980_v8 = vadd.f32 %v1979_v63, %v4527_v58 }
 0x2a3   : > { %v2124_v7 = vadd.f32 %v2123_v27, %v2075_v5 }
 0x2a4   : > { %2174 = vmatmul.bf16.gmra.mxu0 %v4429_v60  ;;  %v2029_v9 = vadd.f32 %v2028_v28, %v1980_v8 }
 0x2a5   : > { %v2356_v12 = vpack.c.bf16 %v2124_v7, %v2026_v6  ;;  %2223 = vmatmul.bf16.gmra.mxu1 %v4431_v44  ;;  %2272 = vmatmul.bf16.gmra.mxu2 %v4429_v60 }
 0x2a6   : > { %2321 = vmatmul.bf16.gmra.mxu3 %v4431_v44 }
 0x2a7   : > { %2388 = vst [vmem:[%s3288_s7 + $0x70] sm:$0xff] %v2356_v12 }
 0x2a8   : > { %v2077_v20 = vpop.f32.mrf.mxu2 }
 0x2a9   : > { %v2078_v10 = vadd.f32 %v2077_v20, %v4534_v53  ;;  %v2126_v11 = vpop.f32.mrf.mxu3  ;;  %v1981_v22 = vpop.f32.mrf.mxu0 }
 0x2aa   : > { %v2030_v33 = vpop.f32.mrf.mxu1  ;;  %v1982_v15 = vadd.f32 %v1981_v22, %v4527_v58 }
 0x2ab   : > { %v2127_v14 = vadd.f32 %v2126_v11, %v2078_v10 }
 0x2ac   : > { %v2031_v4 = vadd.f32 %v2030_v33, %v1982_v15 }
 0x2ad   : > { %v2358_v18 = vpack.c.bf16 %v2127_v14, %v2029_v9 }
 0x2af   : > { %2390 = vst [vmem:[%s3288_s7 + $0x80] sm:$0xff] %v2358_v18 }
 0x2b0   : > { %v2079_v34 = vpop.f32.mrf.mxu2 }
 0x2b1   : > { %v2080_v3 = vadd.f32 %v2079_v34, %v4534_v53  ;;  %v2128_v60 = vpop.f32.mrf.mxu3  ;;  %v1984_v35 = vpop.f32.mrf.mxu0 }
 0x2b2   : > { %v2033_v44 = vpop.f32.mrf.mxu1  ;;  %v1985_v26 = vadd.f32 %v1984_v35, %v4527_v58  ;;  %v4616_v35 = vperm.slane %v4524_v48, 3 }
 0x2b3   : > { %v2129_v37 = vadd.f32 %v2128_v60, %v2080_v3 }
 0x2b4   : > { %2179 = vmatmul.bf16.gmra.mxu0 %v4465_v39  ;;  %v2034_v57 = vadd.f32 %v2033_v44, %v1985_v26 }
 0x2b5   : > { %v2360_v38 = vpack.c.bf16 %v2129_v37, %v2031_v4  ;;  %2228 = vmatmul.bf16.gmra.mxu1 %v4467_v13  ;;  %2277 = vmatmul.bf16.gmra.mxu2 %v4465_v39 }
 0x2b6   : > { %2326 = vmatmul.bf16.gmra.mxu3 %v4467_v13 }
 0x2b7   : > { %2392 = vst [vmem:[%s3288_s7 + $0x90] sm:$0xff] %v2360_v38 }
 0x2b8   : > { %v2082_v56 = vpop.f32.mrf.mxu2 }
 0x2b9   : > { %v2083_v43 = vadd.f32 %v2082_v56, %v4534_v53  ;;  %v2131_v45 = vpop.f32.mrf.mxu3  ;;  %v1986_v17 = vpop.f32.mrf.mxu0 }
 0x2ba   : > { %v2035_v32 = vpop.f32.mrf.mxu1  ;;  %v1987_v49 = vadd.f32 %v1986_v17, %v4527_v58 }
 0x2bb   : > { %v2132_v19 = vadd.f32 %v2131_v45, %v2083_v43 }
 0x2bc   : > { %v2036_v16 = vadd.f32 %v2035_v32, %v1987_v49 }
 0x2bd   : > { %v2362_v21 = vpack.c.bf16 %v2132_v19, %v2034_v57 }
 0x2bf   : > { %2394 = vst [vmem:[%s3288_s7 + $0xa0] sm:$0xff] %v2362_v21 }
 0x2c0   : > { %v2084_v25 = vpop.f32.mrf.mxu2 }
 0x2c1   : > { %v2085_v29 = vadd.f32 %v2084_v25, %v4534_v53  ;;  %v2133_v39 = vpop.f32.mrf.mxu3  ;;  %v1989_v50 = vpop.f32.mrf.mxu0 }
 0x2c2   : > { %v2038_v13 = vpop.f32.mrf.mxu1  ;;  %v1990_v52 = vadd.f32 %v1989_v50, %v4527_v58 }
 0x2c3   : > { %v2134_v51 = vadd.f32 %v2133_v39, %v2085_v29 }
 0x2c4   : > { %2184 = vmatmul.bf16.gmra.mxu0 %v4501_v59  ;;  %v2039_v41 = vadd.f32 %v2038_v13, %v1990_v52 }
 0x2c5   : > { %v2364_v31 = vpack.c.bf16 %v2134_v51, %v2036_v16  ;;  %2233 = vmatmul.bf16.gmra.mxu1 %v4503_v24  ;;  %2282 = vmatmul.bf16.gmra.mxu2 %v4501_v59 }
 0x2c6   : > { %2331 = vmatmul.bf16.gmra.mxu3 %v4503_v24 }
 0x2c7   : > { %2396 = vst [vmem:[%s3288_s7 + $0xb0] sm:$0xff] %v2364_v31 }
 0x2c8   : > { %v2087_v54 = vpop.f32.mrf.mxu2 }
 0x2c9   : > { %v2088_v23 = vadd.f32 %v2087_v54, %v4534_v53  ;;  %v2136_v36 = vpop.f32.mrf.mxu3  ;;  %v1991_v55 = vpop.f32.mrf.mxu0 }
 0x2ca   : > { %v2040_v42 = vpop.f32.mrf.mxu1  ;;  %v1992_v46 = vadd.f32 %v1991_v55, %v4527_v58 }
 0x2cb   : > { %v2137_v61 = vadd.f32 %v2136_v36, %v2088_v23 }
 0x2cc   : > { %v2041_v2 = vadd.f32 %v2040_v42, %v1992_v46 }
 0x2cd   : > { %v2366_v62 = vpack.c.bf16 %v2137_v61, %v2039_v41 }
 0x2cf   : > { %2398 = vst [vmem:[%s3288_s7 + $0xc0] sm:$0xff] %v2366_v62 }
 0x2d0   : > { %v2089_v0 = vpop.f32.mrf.mxu2 }
 0x2d1   : > { %v2090_v40 = vadd.f32 %v2089_v0, %v4534_v53  ;;  %v2138_v59 = vpop.f32.mrf.mxu3  ;;  %v1994_v1 = vpop.f32.mrf.mxu0 }
 0x2d2   : > { %v2043_v24 = vpop.f32.mrf.mxu1  ;;  %v1995_v63 = vadd.f32 %v1994_v1, %v4527_v58 }
 0x2d3   : > { %v2139_v5 = vadd.f32 %v2138_v59, %v2090_v40 }
 0x2d4   : > { %2189 = vmatmul.bf16.gmra.mxu0 %v4513_v30  ;;  %v2044_v6 = vadd.f32 %v2043_v24, %v1995_v63 }
 0x2d5   : > { %v2368_v27 = vpack.c.bf16 %v2139_v5, %v2041_v2  ;;  %2238 = vmatmul.bf16.gmra.mxu1 %v4515_v47  ;;  %2287 = vmatmul.bf16.gmra.mxu2 %v4513_v30 }
 0x2d6   : > { %2336 = vmatmul.bf16.gmra.mxu3 %v4515_v47  ;;  %v4612_v47 = vperm.slane %v4524_v48, 2 }
 0x2d7   : > { %2400 = vst [vmem:[%s3288_s7 + $0xd0] sm:$0xff] %v2368_v27 }
 0x2d8   : > { %v2092_v28 = vpop.f32.mrf.mxu2 }
 0x2d9   : > { %v2093_v7 = vadd.f32 %v2092_v28, %v4534_v53  ;;  %v2141_v12 = vpop.f32.mrf.mxu3  ;;  %v1996_v8 = vpop.f32.mrf.mxu0 }
 0x2da   : > { %v2045_v20 = vpop.f32.mrf.mxu1  ;;  %v1997_v11 = vadd.f32 %v1996_v8, %v4527_v58 }
 0x2db   : > { %v2142_v9 = vadd.f32 %v2141_v12, %v2093_v7 }
 0x2dc   : > { %v2046_v15 = vadd.f32 %v2045_v20, %v1997_v11 }
 0x2dd   : > { %v2370_v10 = vpack.c.bf16 %v2142_v9, %v2044_v6 }
 0x2df   : > { %2402 = vst [vmem:[%s3288_s7 + $0xe0] sm:$0xff] %v2370_v10 }
 0x2e0   : > { %v2094_v22 = vpop.f32.mrf.mxu2 }
 0x2e1   : > { %v2095_v33 = vadd.f32 %v2094_v22, %v4534_v53  ;;  %v2143_v30 = vpop.f32.mrf.mxu3  ;;  %v2155_v14 = vpop.f32.mrf.mxu0 }
 0x2e2   : > { %v2204_v18 = vpop.f32.mrf.mxu1  ;;  %v2156_v60 = vadd.f32 %v2155_v14, %v4612_v47 }
 0x2e3   : > { %v2144_v34 = vadd.f32 %v2143_v30, %v2095_v33 }
 0x2e4   : > { %v2205_v44 = vadd.f32 %v2204_v18, %v2156_v60 }
 0x2e5   : > { %v2372_v3 = vpack.c.bf16 %v2144_v34, %v2046_v15 }
 0x2e7   : > { %2404 = vst [vmem:[%s3288_s7 + $0xf0] sm:$0xff] %v2372_v3 }
 0x2e8   : > { %v2253_v58 = vpop.f32.mrf.mxu2 }
 0x2e9   : > { %v2254_v53 = vadd.f32 %v2253_v58, %v4616_v35  ;;  %v2302_v4 = vpop.f32.mrf.mxu3  ;;  %v2157_v37 = vpop.f32.mrf.mxu0 }
 0x2ea   : > { %v2206_v38 = vpop.f32.mrf.mxu1  ;;  %v2158_v57 = vadd.f32 %v2157_v37, %v4612_v47 }
 0x2eb   : > { %v2303_v26 = vadd.f32 %v2302_v4, %v2254_v53 }
 0x2ec   : > { %v2207_v19 = vadd.f32 %v2206_v38, %v2158_v57 }
 0x2ed   : > { %v2343_v56 = vpack.c.bf16 %v2303_v26, %v2205_v44 }
 0x2ef   : > { %2375 = vst [vmem:[%s3288_s7 + $0x8] sm:$0xff] %v2343_v56 }
 0x2f0   : > { %v2255_v43 = vpop.f32.mrf.mxu2 }
 0x2f1   : > { %v2256_v45 = vadd.f32 %v2255_v43, %v4616_v35  ;;  %v2304_v17 = vpop.f32.mrf.mxu3  ;;  %v2160_v48 = vpop.f32.mrf.mxu0 }
 0x2f2   : > { %v2209_v32 = vpop.f32.mrf.mxu1  ;;  %v2161_v25 = vadd.f32 %v2160_v48, %v4612_v47 }
 0x2f3   : > { %v2305_v21 = vadd.f32 %v2304_v17, %v2256_v45 }
 0x2f4   : > { %v2210_v39 = vadd.f32 %v2209_v32, %v2161_v25 }
 0x2f5   : > { %v2345_v49 = vpack.c.bf16 %v2305_v21, %v2207_v19 }
 0x2f7   : > { %2377 = vst [vmem:[%s3288_s7 + $0x18] sm:$0xff] %v2345_v49 }
 0x2f8   : > { %v2258_v29 = vpop.f32.mrf.mxu2 }
 0x2f9   : > { %v2259_v50 = vadd.f32 %v2258_v29, %v4616_v35  ;;  %v2307_v13 = vpop.f32.mrf.mxu3  ;;  %v2162_v16 = vpop.f32.mrf.mxu0 }
 0x2fa   : > { %v2211_v51 = vpop.f32.mrf.mxu1  ;;  %v2163_v54 = vadd.f32 %v2162_v16, %v4612_v47 }
 0x2fb   : > { %v2308_v31 = vadd.f32 %v2307_v13, %v2259_v50 }
 0x2fc   : > { %v2212_v61 = vadd.f32 %v2211_v51, %v2163_v54 }
 0x2fd   : > { %v2347_v52 = vpack.c.bf16 %v2308_v31, %v2210_v39 }
 0x2ff   : > { %2379 = vst [vmem:[%s3288_s7 + $0x28] sm:$0xff] %v2347_v52 }
 0x300   : > { %v2260_v41 = vpop.f32.mrf.mxu2 }
 0x301   : > { %v2261_v23 = vadd.f32 %v2260_v41, %v4616_v35  ;;  %v2309_v36 = vpop.f32.mrf.mxu3  ;;  %v2165_v55 = vpop.f32.mrf.mxu0 }
 0x302   : > { %v2214_v42 = vpop.f32.mrf.mxu1  ;;  %v2166_v0 = vadd.f32 %v2165_v55, %v4612_v47 }
 0x303   : > { %v2310_v62 = vadd.f32 %v2309_v36, %v2261_v23 }
 0x304   : > { %v2215_v59 = vadd.f32 %v2214_v42, %v2166_v0 }
 0x305   : > { %v2349_v46 = vpack.c.bf16 %v2310_v62, %v2212_v61 }
 0x307   : > { %2381 = vst [vmem:[%s3288_s7 + $0x38] sm:$0xff] %v2349_v46 }
 0x308   : > { %v2263_v40 = vpop.f32.mrf.mxu2 }
 0x309   : > { %v2264_v1 = vadd.f32 %v2263_v40, %v4616_v35  ;;  %v2312_v24 = vpop.f32.mrf.mxu3  ;;  %v2167_v2 = vpop.f32.mrf.mxu0 }
 0x30a   : > { %v2216_v5 = vpop.f32.mrf.mxu1  ;;  %v2168_v28 = vadd.f32 %v2167_v2, %v4612_v47 }
 0x30b   : > { %v2313_v27 = vadd.f32 %v2312_v24, %v2264_v1 }
 0x30c   : > { %v2217_v9 = vadd.f32 %v2216_v5, %v2168_v28 }
 0x30d   : > { %v2351_v63 = vpack.c.bf16 %v2313_v27, %v2215_v59 }
 0x30f   : > { %2383 = vst [vmem:[%s3288_s7 + $0x48] sm:$0xff] %v2351_v63 }
 0x310   : > { %v2265_v6 = vpop.f32.mrf.mxu2 }
 0x311   : > { %v2266_v7 = vadd.f32 %v2265_v6, %v4616_v35  ;;  %v2314_v12 = vpop.f32.mrf.mxu3  ;;  %v2170_v8 = vpop.f32.mrf.mxu0 }
 0x312   : > { %v2219_v20 = vpop.f32.mrf.mxu1  ;;  %v2171_v22 = vadd.f32 %v2170_v8, %v4612_v47 }
 0x313   : > { %v2315_v10 = vadd.f32 %v2314_v12, %v2266_v7 }
 0x314   : > { %v2220_v30 = vadd.f32 %v2219_v20, %v2171_v22 }
 0x315   : > { %v2353_v11 = vpack.c.bf16 %v2315_v10, %v2217_v9 }
 0x317   : > { %2385 = vst [vmem:[%s3288_s7 + $0x58] sm:$0xff] %v2353_v11 }
 0x318   : > { %v2268_v33 = vpop.f32.mrf.mxu2 }
 0x319   : > { %v2269_v14 = vadd.f32 %v2268_v33, %v4616_v35  ;;  %v2317_v18 = vpop.f32.mrf.mxu3  ;;  %v2172_v15 = vpop.f32.mrf.mxu0 }
 0x31a   : > { %v2221_v34 = vpop.f32.mrf.mxu1  ;;  %v2173_v58 = vadd.f32 %v2172_v15, %v4612_v47 }
 0x31b   : > { %v2318_v3 = vadd.f32 %v2317_v18, %v2269_v14 }
 0x31c   : > { %v2222_v26 = vadd.f32 %v2221_v34, %v2173_v58 }
 0x31d   : > { %v2355_v60 = vpack.c.bf16 %v2318_v3, %v2220_v30 }
 0x31f   : > { %2387 = vst [vmem:[%s3288_s7 + $0x68] sm:$0xff] %v2355_v60 }
 0x320   : > { %v2270_v44 = vpop.f32.mrf.mxu2 }
 0x321   : > { %v2271_v53 = vadd.f32 %v2270_v44, %v4616_v35  ;;  %v2319_v4 = vpop.f32.mrf.mxu3  ;;  %v2175_v37 = vpop.f32.mrf.mxu0 }
 0x322   : > { %v2224_v38 = vpop.f32.mrf.mxu1  ;;  %v2176_v43 = vadd.f32 %v2175_v37, %v4612_v47 }
 0x323   : > { %v2320_v56 = vadd.f32 %v2319_v4, %v2271_v53 }
 0x324   : > { %v2225_v17 = vadd.f32 %v2224_v38, %v2176_v43 }
 0x325   : > { %v2357_v57 = vpack.c.bf16 %v2320_v56, %v2222_v26 }
 0x327   : > { %2389 = vst [vmem:[%s3288_s7 + $0x78] sm:$0xff] %v2357_v57 }
 0x328   : > { %v2273_v45 = vpop.f32.mrf.mxu2 }
 0x329   : > { %v2274_v48 = vadd.f32 %v2273_v45, %v4616_v35  ;;  %v2322_v32 = vpop.f32.mrf.mxu3  ;;  %v2177_v19 = vpop.f32.mrf.mxu0 }
 0x32a   : > { %v2226_v21 = vpop.f32.mrf.mxu1  ;;  %v2178_v29 = vadd.f32 %v2177_v19, %v4612_v47 }
 0x32b   : > { %v2323_v49 = vadd.f32 %v2322_v32, %v2274_v48 }
 0x32c   : > { %v2227_v31 = vadd.f32 %v2226_v21, %v2178_v29 }
 0x32d   : > { %v2359_v25 = vpack.c.bf16 %v2323_v49, %v2225_v17 }
 0x32f   : > { %2391 = vst [vmem:[%s3288_s7 + $0x88] sm:$0xff] %v2359_v25 }
 0x330   : > { %v2275_v39 = vpop.f32.mrf.mxu2 }
 0x331   : > { %v2276_v50 = vadd.f32 %v2275_v39, %v4616_v35  ;;  %v2324_v13 = vpop.f32.mrf.mxu3  ;;  %v2180_v16 = vpop.f32.mrf.mxu0 }
 0x332   : > { %v2229_v51 = vpop.f32.mrf.mxu1  ;;  %v2181_v41 = vadd.f32 %v2180_v16, %v4612_v47 }
 0x333   : > { %v2325_v52 = vadd.f32 %v2324_v13, %v2276_v50 }
 0x334   : > { %v2230_v36 = vadd.f32 %v2229_v51, %v2181_v41 }
 0x335   : > { %v2361_v54 = vpack.c.bf16 %v2325_v52, %v2227_v31 }
 0x337   : > { %2393 = vst [vmem:[%s3288_s7 + $0x98] sm:$0xff] %v2361_v54 }
 0x338   : > { %v2278_v23 = vpop.f32.mrf.mxu2 }
 0x339   : > { %v2279_v55 = vadd.f32 %v2278_v23, %v4616_v35  ;;  %v2327_v42 = vpop.f32.mrf.mxu3  ;;  %v2182_v61 = vpop.f32.mrf.mxu0 }
 0x33a   : > { %v2231_v62 = vpop.f32.mrf.mxu1  ;;  %v2183_v40 = vadd.f32 %v2182_v61, %v4612_v47 }
 0x33b   : > { %v2328_v46 = vadd.f32 %v2327_v42, %v2279_v55 }
 0x33c   : > { %v2232_v5 = vadd.f32 %v2231_v62, %v2183_v40 }
 0x33d   : > { %v2363_v0 = vpack.c.bf16 %v2328_v46, %v2230_v36 }
 0x33f   : > { %2395 = vst [vmem:[%s3288_s7 + $0xa8] sm:$0xff] %v2363_v0 }
 0x340   : > { %v2280_v59 = vpop.f32.mrf.mxu2 }
 0x341   : > { %v2281_v1 = vadd.f32 %v2280_v59, %v4616_v35  ;;  %v2329_v24 = vpop.f32.mrf.mxu3  ;;  %v2185_v2 = vpop.f32.mrf.mxu0 }
 0x342   : > { %v2234_v63 = vpop.f32.mrf.mxu1  ;;  %v2186_v6 = vadd.f32 %v2185_v2, %v4612_v47 }
 0x343   : > { %v2330_v27 = vadd.f32 %v2329_v24, %v2281_v1 }
 0x344   : > { %v2235_v12 = vadd.f32 %v2234_v63, %v2186_v6 }
 0x345   : > { %v2365_v28 = vpack.c.bf16 %v2330_v27, %v2232_v5 }
 0x347   : > { %2397 = vst [vmem:[%s3288_s7 + $0xb8] sm:$0xff] %v2365_v28 }
 0x348   : > { %v2283_v7 = vpop.f32.mrf.mxu2 }
 0x349   : > { %v2284_v8 = vadd.f32 %v2283_v7, %v4616_v35  ;;  %v2332_v20 = vpop.f32.mrf.mxu3  ;;  %v2187_v9 = vpop.f32.mrf.mxu0 }
 0x34a   : > { %v2236_v22 = vpop.f32.mrf.mxu1  ;;  %v2188_v33 = vadd.f32 %v2187_v9, %v4612_v47 }
 0x34b   : > { %v2333_v10 = vadd.f32 %v2332_v20, %v2284_v8 }
 0x34c   : > { %v2237_v34 = vadd.f32 %v2236_v22, %v2188_v33 }
 0x34d   : > { %v2367_v11 = vpack.c.bf16 %v2333_v10, %v2235_v12 }
 0x34f   : > { %2399 = vst [vmem:[%s3288_s7 + $0xc8] sm:$0xff] %v2367_v11 }
 0x350   : > { %v2285_v30 = vpop.f32.mrf.mxu2 }
 0x351   : > { %v2286_v14 = vadd.f32 %v2285_v30, %v4616_v35  ;;  %v2334_v18 = vpop.f32.mrf.mxu3  ;;  %v2190_v15 = vpop.f32.mrf.mxu0 }
 0x352   : > { %v2191_v58 = vadd.f32 %v2190_v15, %v4612_v47  ;;  %v2239_v44 = vpop.f32.mrf.mxu1 }
 0x353   : > { %v2335_v3 = vadd.f32 %v2334_v18, %v2286_v14 }
 0x354   : > { %v2240_v4 = vadd.f32 %v2239_v44, %v2191_v58 }
 0x355   : > { %v2369_v60 = vpack.c.bf16 %v2335_v3, %v2237_v34 }
 0x357   : > { %2401 = vst [vmem:[%s3288_s7 + $0xd8] sm:$0xff] %v2369_v60 }
 0x358   : > { %v2288_v53 = vpop.f32.mrf.mxu2 }
 0x359   : > { %v2289_v37 = vadd.f32 %v2288_v53, %v4616_v35  ;;  %v2337_v38 = vpop.f32.mrf.mxu3  ;;  %v2192_v56 = vpop.f32.mrf.mxu0 }
 0x35a   : > { %v2193_v43 = vadd.f32 %v2192_v56, %v4612_v47  ;;  %v2241_v48 = vpop.f32.mrf.mxu1 }
 0x35b   : > { %v2338_v26 = vadd.f32 %v2337_v38, %v2289_v37 }
 0x35c   : > { %v2242_v19 = vadd.f32 %v2241_v48, %v2193_v43 }
 0x35d   : > { %v2371_v57 = vpack.c.bf16 %v2338_v26, %v2240_v4 }
 0x35f   : > { %2403 = vst [vmem:[%s3288_s7 + $0xe8] sm:$0xff] %v2371_v57 }
 0x360   : > { %v2290_v45 = vpop.f32.mrf.mxu2 }
 0x361   : > { %v2291_v17 = vadd.f32 %v2290_v45, %v4616_v35  ;;  %v2339_v32 = vpop.f32.mrf.mxu3 }
 0x363   : > { %v2340_v21 = vadd.f32 %v2339_v32, %v2291_v17 }
 0x365   : > { %v2373_v49 = vpack.c.bf16 %v2340_v21, %v2242_v19 }
 0x367   : > { %2405 = vst [vmem:[%s3288_s7 + $0xf8] sm:$0xff] %v2373_v49 }
 0x368 PF: > { %s14_s15 = sadd.s32 1, %s3234_s15  }
 0x369   : > { %p11_p10 = scmp.ge.s32.totalorder %s14_s15, 4  }
 0x36b   :  { %13 = sbr.rel (!%p11_p10) target bundleno = 1 (0x1), region = 77 }

</bundles_post_ra>
